<compile_context>
chip_gen: v6e
topology: v6e:2x2x1
jax: 0.10.0
libtpu: 0.0.40
codegen_flags: <defaults>
</compile_context>

<pallas_src>
import functools

import jax
import jax.numpy as jnp
import numpy as np
from jax import lax
from jax.experimental import pallas as pl
from jax.experimental.pallas import tpu as pltpu

T = 20                       # number of diffusion timesteps
_IN_FEATURES = 5             # raw data features
_TIME_FEATURES = 4           # sinusoidal encoding width
_XT_FEATURES = _IN_FEATURES + _TIME_FEATURES   # 9
_SUBLANES = 8                # f32 sublanes per vreg
_LANES = 128                 # lanes per vreg
_ALIGN = _SUBLANES * _LANES  # 1024 = one full f32 vreg of batch elements

# (n_in, n_out) of the four nn.Linear layers: encoder 9->4->2, decoder 2->4->9.
_LAYER_DIMS = ((9, 4), (4, 2), (2, 4), (4, 9))


def _param_offsets():
    """Flat offsets of (W, b) per layer inside the packed parameter vector."""
    offs, o = [], 0
    for n_in, n_out in _LAYER_DIMS:
        w_off = o
        o += n_in * n_out
        b_off = o
        o += n_out
        offs.append((w_off, b_off))
    return tuple(offs), o


_PARAM_OFFSETS, _NUM_PARAMS = _param_offsets()     # 107 floats total


def _autoencoder_kernel(xt_ref, p_ref, xhat_ref):
    """xt_ref: (9, tb//128, 128) VMEM; p_ref: (107,) SMEM; xhat_ref: (9, tb//128, 128).

    Lane-dense layout: the batch rides (sublane, lane); features sit on the
    leading axis.  The inner fori_loop walks one-vreg (8, 128) chunks so vreg
    residency stays bounded independent of the batch tile size.
    """
    n_chunks = xt_ref.shape[1] // _SUBLANES      # static

    def chunk_body(c, carry):
        off = pl.multiple_of(c * _SUBLANES, _SUBLANES)

        # Load the 9 xt feature slabs for this chunk: each is one dense vreg.
        h = [xt_ref[pl.ds(j, 1), pl.ds(off, _SUBLANES), :]
             for j in range(_XT_FEATURES)]

        # Four tiny linears as unrolled scalar-broadcast FMAs on the VPU.
        for layer, (n_in, n_out) in enumerate(_LAYER_DIMS):
            w_off, b_off = _PARAM_OFFSETS[layer]
            outs = []
            for j in range(n_out):
                acc = p_ref[w_off + j * n_in] * h[0]
                for k in range(1, n_in):
                    acc = acc + p_ref[w_off + j * n_in + k] * h[k]
                outs.append(acc + p_ref[b_off + j])
            if layer < len(_LAYER_DIMS) - 1:
                h = [jnp.maximum(v, 0.0) for v in outs]            # ReLU
            else:
                # sigmoid(x) == 0.5 * tanh(0.5 * x) + 0.5 : single EUP op.
                h = [0.5 * jnp.tanh(0.5 * v) + 0.5 for v in outs]

        # Dense, unmasked stores of the 9 output feature slabs.
        for j in range(_XT_FEATURES):
            xhat_ref[pl.ds(j, 1), pl.ds(off, _SUBLANES), :] = h[j]
        return carry

    lax.fori_loop(0, n_chunks, chunk_body, 0)


def _round_up(n, m):
    return ((n + m - 1) // m) * m


def _encoding_table(num_steps):
    """Pure-JAX port of the reference sinusoidal `encoding(T)` table, (T, 4)."""
    d, n = 4, 10000.0
    k = jnp.arange(num_steps, dtype=jnp.float32)[:, None]
    i = jnp.arange(d // 2, dtype=jnp.float32)[None, :]
    ang = k / jnp.power(n, 2.0 * i / d)
    P = jnp.zeros((num_steps, d), jnp.float32)
    P = P.at[:, 0::2].set(jnp.sin(ang))
    P = P.at[:, 1::2].set(jnp.cos(ang))
    return P


@functools.partial(jax.jit, static_argnames=("tb",))
def autoencoder_forward(packed_params, x, t, *, tb=32768):
    """x: (B, 5) float32, t: (B,) integer timesteps in [0, T). Returns (xhat, xt)."""
    B = x.shape[0]

    # xt = concat([x, posn[t]]) is built here (tiny constant table gather) and
    # returned directly — the kernel never writes it back to HBM.
    t_bar = _encoding_table(T)[t, :]                                   # (B, 4)
    xt = jnp.concatenate([x.astype(jnp.float32), t_bar], axis=1)       # (B, 9)

    # Tile sizing: align everything to full f32 vregs (1024 batch elements);
    # cap the tile at ceil(Bp/2) so the grid has >= 2 steps whenever possible
    # (lets v7x shard the batch across its 2 TensorCores).
    Bp0 = _round_up(B, _ALIGN)
    tb_eff = min(tb, Bp0)
    if Bp0 >= 2 * _ALIGN:
        tb_eff = min(tb_eff, _round_up(pl.cdiv(Bp0, 2), _ALIGN))
    tb_eff = _round_up(max(tb_eff, _ALIGN), _ALIGN)
    Bp = _round_up(Bp0, tb_eff)
    grid = (Bp // tb_eff,)

    # Layout plumbing: (B, 9) -> (9, Bp) -> dense (9, Bp//128, 128) slabs so the
    # kernel sees full (8, 128) vregs per feature chunk.  Padded columns are
    # zeros and produce benign garbage that is sliced off below.
    xtT = jnp.pad(xt.T, ((0, 0), (0, Bp - B))).reshape(
        _XT_FEATURES, Bp // _LANES, _LANES)

    cost = pl.CostEstimate(
        flops=2 * 88 * Bp,                                   # 36+8+8+36 MACs/elem
        transcendentals=9 * Bp,                              # 9 tanh-sigmoids/elem
        bytes_accessed=2 * _XT_FEATURES * 4 * Bp + 4 * _NUM_PARAMS,
    )

    xhatT = pl.pallas_call(
        _autoencoder_kernel,
        grid=grid,
        in_specs=[
            pl.BlockSpec((_XT_FEATURES, tb_eff // _LANES, _LANES),
                         lambda i: (0, i, 0)),
            # Packed params: one tiny transfer into SMEM, resident for all steps.
            pl.BlockSpec(memory_space=pltpu.MemorySpace.SMEM),
        ],
        out_specs=pl.BlockSpec((_XT_FEATURES, tb_eff // _LANES, _LANES),
                               lambda i: (0, i, 0)),
        out_shape=jax.ShapeDtypeStruct(
            (_XT_FEATURES, Bp // _LANES, _LANES), jnp.float32),
        compiler_params=pltpu.CompilerParams(
            dimension_semantics=("parallel",),
        ),
        cost_estimate=cost,
    )(xtT, packed_params)

    # Back to the PyTorch-facing (B, 9) orientation (single output transpose).
    xhat = xhatT.reshape(_XT_FEATURES, Bp)[:, :B].T
    return xhat, xt


def init_params(key):
    """PyTorch nn.Linear-style init (uniform +-1/sqrt(fan_in)).

    Weights are kept in (out, in) layout — identical to torch — and flattened
    row-major into one packed (107,) vector for the kernel's SMEM slot.
    """
    raw = []
    keys = jax.random.split(key, len(_LAYER_DIMS))
    for (n_in, n_out), k in zip(_LAYER_DIMS, keys):
        kw, kb = jax.random.split(k)
        bound = 1.0 / float(n_in) ** 0.5
        w = jax.random.uniform(kw, (n_out, n_in), jnp.float32, -bound, bound)
        b = jax.random.uniform(kb, (n_out,), jnp.float32, -bound, bound)
        raw.append((w, b))
    packed = jnp.concatenate([p.reshape(-1) for wb in raw for p in wb])
    return packed, raw


def autoencoder_reference(raw, x, t):
    """Pure-JAX reference of the PyTorch forward, for correctness checking."""
    (w1, b1), (w2, b2), (w3, b3), (w4, b4) = raw
    t_bar = _encoding_table(T)[t, :]
    xt = jnp.concatenate([x.astype(jnp.float32), t_bar], axis=1)
    h1 = jax.nn.relu(xt @ w1.T + b1)
    z = jax.nn.relu(h1 @ w2.T + b2)
    h3 = jax.nn.relu(z @ w3.T + b3)
    xhat = jax.nn.sigmoid(h3 @ w4.T + b4)
    return xhat, xt


if __name__ == "__main__":
    key = jax.random.PRNGKey(0)
    kp, kx, kt = jax.random.split(key, 3)
    packed, raw = init_params(kp)

    # Small shapes consistent with the module: x has 5 data features (+4 time enc = 9).
    B = 2
    x = jax.random.normal(kx, (B, _IN_FEATURES), dtype=jnp.float32)
    t = jnp.array([3, 17], dtype=jnp.int32)

    xhat, xt = autoencoder_forward(packed, x, t)
    jax.block_until_ready((xhat, xt))
    assert xhat.shape == (B, _XT_FEATURES) and xhat.dtype == jnp.float32
    assert xt.shape == (B, _XT_FEATURES) and xt.dtype == jnp.float32

    xhat_ref, xt_ref = autoencoder_reference(raw, x, t)
    np.testing.assert_allclose(np.asarray(xhat), np.asarray(xhat_ref), atol=1e-3, rtol=1e-3)
    np.testing.assert_allclose(np.asarray(xt), np.asarray(xt_ref), atol=1e-3, rtol=1e-3)

    # Larger, non-aligned batch exercising the multi-step "parallel" grid + padding.
    B2 = 3000
    x2 = jax.random.normal(kx, (B2, _IN_FEATURES), dtype=jnp.float32)
    t2 = jax.random.randint(kt, (B2,), 0, T, dtype=jnp.int32)
    xhat2, xt2 = autoencoder_forward(packed, x2, t2)
    jax.block_until_ready((xhat2, xt2))
    xhat2_ref, xt2_ref = autoencoder_reference(raw, x2, t2)
    np.testing.assert_allclose(np.asarray(xhat2), np.asarray(xhat2_ref), atol=1e-3, rtol=1e-3)
    np.testing.assert_allclose(np.asarray(xt2), np.asarray(xt2_ref), atol=1e-3, rtol=1e-3)

    print("KERNEL_OK")
</pallas_src>

<mosaic_0001>
module attributes {stable_mosaic.version = 11 : i64} {
  func.func @_autoencoder_kernel(%arg0: i32, %arg1: memref<9x8x128xf32, #tpu.memory_space<vmem>>, %arg2: memref<107xf32, #tpu.memory_space<smem>>, %arg3: memref<9x8x128xf32, #tpu.memory_space<vmem>>) attributes {dimension_semantics = [#tpu.dimension_semantics<parallel>], iteration_bounds = array<i64: 1>, scalar_prefetch = 0 : i64, scratch_operands = 0 : i64, tpu.core_type = #tpu.core_type<tc>, window_params = [{transform_indices = @transform_0, window_bounds = array<i64: 9, 8, 128>}, {transform_indices = @transform_1, window_bounds = array<i64: 107>}, {transform_indices = @transform_2, window_bounds = array<i64: 9, 8, 128>}]} {
    %c0_i32 = arith.constant 0 : i32
    %c8_i32 = arith.constant 8 : i32
    %0 = arith.muli %c0_i32, %c8_i32 : i32
    %1 = tpu.assume_multiple %0, 8 : i32
    %c0 = arith.constant 0 : index
    %2 = arith.index_cast %1 : i32 to index
    %c0_0 = arith.constant 0 : index
    %3 = vector.load %arg1[%c0, %2, %c0_0] : memref<9x8x128xf32, #tpu.memory_space<vmem>>, vector<1x8x128xf32>
    %c1 = arith.constant 1 : index
    %4 = arith.index_cast %1 : i32 to index
    %c0_1 = arith.constant 0 : index
    %5 = vector.load %arg1[%c1, %4, %c0_1] : memref<9x8x128xf32, #tpu.memory_space<vmem>>, vector<1x8x128xf32>
    %c2 = arith.constant 2 : index
    %6 = arith.index_cast %1 : i32 to index
    %c0_2 = arith.constant 0 : index
    %7 = vector.load %arg1[%c2, %6, %c0_2] : memref<9x8x128xf32, #tpu.memory_space<vmem>>, vector<1x8x128xf32>
    %c3 = arith.constant 3 : index
    %8 = arith.index_cast %1 : i32 to index
    %c0_3 = arith.constant 0 : index
    %9 = vector.load %arg1[%c3, %8, %c0_3] : memref<9x8x128xf32, #tpu.memory_space<vmem>>, vector<1x8x128xf32>
    %c4 = arith.constant 4 : index
    %10 = arith.index_cast %1 : i32 to index
    %c0_4 = arith.constant 0 : index
    %11 = vector.load %arg1[%c4, %10, %c0_4] : memref<9x8x128xf32, #tpu.memory_space<vmem>>, vector<1x8x128xf32>
    %c5 = arith.constant 5 : index
    %12 = arith.index_cast %1 : i32 to index
    %c0_5 = arith.constant 0 : index
    %13 = vector.load %arg1[%c5, %12, %c0_5] : memref<9x8x128xf32, #tpu.memory_space<vmem>>, vector<1x8x128xf32>
    %c6 = arith.constant 6 : index
    %14 = arith.index_cast %1 : i32 to index
    %c0_6 = arith.constant 0 : index
    %15 = vector.load %arg1[%c6, %14, %c0_6] : memref<9x8x128xf32, #tpu.memory_space<vmem>>, vector<1x8x128xf32>
    %c7 = arith.constant 7 : index
    %16 = arith.index_cast %1 : i32 to index
    %c0_7 = arith.constant 0 : index
    %17 = vector.load %arg1[%c7, %16, %c0_7] : memref<9x8x128xf32, #tpu.memory_space<vmem>>, vector<1x8x128xf32>
    %c8 = arith.constant 8 : index
    %18 = arith.index_cast %1 : i32 to index
    %c0_8 = arith.constant 0 : index
    %19 = vector.load %arg1[%c8, %18, %c0_8] : memref<9x8x128xf32, #tpu.memory_space<vmem>>, vector<1x8x128xf32>
    %c0_9 = arith.constant 0 : index
    %20 = memref.load %arg2[%c0_9] : memref<107xf32, #tpu.memory_space<smem>>
    %21 = vector.broadcast %20 : f32 to vector<1x8x128xf32>
    %22 = arith.mulf %21, %3 : vector<1x8x128xf32>
    %c1_10 = arith.constant 1 : index
    %23 = memref.load %arg2[%c1_10] : memref<107xf32, #tpu.memory_space<smem>>
    %24 = vector.broadcast %23 : f32 to vector<1x8x128xf32>
    %25 = arith.mulf %24, %5 : vector<1x8x128xf32>
    %26 = arith.addf %22, %25 : vector<1x8x128xf32>
    %c2_11 = arith.constant 2 : index
    %27 = memref.load %arg2[%c2_11] : memref<107xf32, #tpu.memory_space<smem>>
    %28 = vector.broadcast %27 : f32 to vector<1x8x128xf32>
    %29 = arith.mulf %28, %7 : vector<1x8x128xf32>
    %30 = arith.addf %26, %29 : vector<1x8x128xf32>
    %c3_12 = arith.constant 3 : index
    %31 = memref.load %arg2[%c3_12] : memref<107xf32, #tpu.memory_space<smem>>
    %32 = vector.broadcast %31 : f32 to vector<1x8x128xf32>
    %33 = arith.mulf %32, %9 : vector<1x8x128xf32>
    %34 = arith.addf %30, %33 : vector<1x8x128xf32>
    %c4_13 = arith.constant 4 : index
    %35 = memref.load %arg2[%c4_13] : memref<107xf32, #tpu.memory_space<smem>>
    %36 = vector.broadcast %35 : f32 to vector<1x8x128xf32>
    %37 = arith.mulf %36, %11 : vector<1x8x128xf32>
    %38 = arith.addf %34, %37 : vector<1x8x128xf32>
    %c5_14 = arith.constant 5 : index
    %39 = memref.load %arg2[%c5_14] : memref<107xf32, #tpu.memory_space<smem>>
    %40 = vector.broadcast %39 : f32 to vector<1x8x128xf32>
    %41 = arith.mulf %40, %13 : vector<1x8x128xf32>
    %42 = arith.addf %38, %41 : vector<1x8x128xf32>
    %c6_15 = arith.constant 6 : index
    %43 = memref.load %arg2[%c6_15] : memref<107xf32, #tpu.memory_space<smem>>
    %44 = vector.broadcast %43 : f32 to vector<1x8x128xf32>
    %45 = arith.mulf %44, %15 : vector<1x8x128xf32>
    %46 = arith.addf %42, %45 : vector<1x8x128xf32>
    %c7_16 = arith.constant 7 : index
    %47 = memref.load %arg2[%c7_16] : memref<107xf32, #tpu.memory_space<smem>>
    %48 = vector.broadcast %47 : f32 to vector<1x8x128xf32>
    %49 = arith.mulf %48, %17 : vector<1x8x128xf32>
    %50 = arith.addf %46, %49 : vector<1x8x128xf32>
    %c8_17 = arith.constant 8 : index
    %51 = memref.load %arg2[%c8_17] : memref<107xf32, #tpu.memory_space<smem>>
    %52 = vector.broadcast %51 : f32 to vector<1x8x128xf32>
    %53 = arith.mulf %52, %19 : vector<1x8x128xf32>
    %54 = arith.addf %50, %53 : vector<1x8x128xf32>
    %c36 = arith.constant 36 : index
    %55 = memref.load %arg2[%c36] : memref<107xf32, #tpu.memory_space<smem>>
    %56 = vector.broadcast %55 : f32 to vector<1x8x128xf32>
    %57 = arith.addf %54, %56 : vector<1x8x128xf32>
    %c9 = arith.constant 9 : index
    %58 = memref.load %arg2[%c9] : memref<107xf32, #tpu.memory_space<smem>>
    %59 = vector.broadcast %58 : f32 to vector<1x8x128xf32>
    %60 = arith.mulf %59, %3 : vector<1x8x128xf32>
    %c10 = arith.constant 10 : index
    %61 = memref.load %arg2[%c10] : memref<107xf32, #tpu.memory_space<smem>>
    %62 = vector.broadcast %61 : f32 to vector<1x8x128xf32>
    %63 = arith.mulf %62, %5 : vector<1x8x128xf32>
    %64 = arith.addf %60, %63 : vector<1x8x128xf32>
    %c11 = arith.constant 11 : index
    %65 = memref.load %arg2[%c11] : memref<107xf32, #tpu.memory_space<smem>>
    %66 = vector.broadcast %65 : f32 to vector<1x8x128xf32>
    %67 = arith.mulf %66, %7 : vector<1x8x128xf32>
    %68 = arith.addf %64, %67 : vector<1x8x128xf32>
    %c12 = arith.constant 12 : index
    %69 = memref.load %arg2[%c12] : memref<107xf32, #tpu.memory_space<smem>>
    %70 = vector.broadcast %69 : f32 to vector<1x8x128xf32>
    %71 = arith.mulf %70, %9 : vector<1x8x128xf32>
    %72 = arith.addf %68, %71 : vector<1x8x128xf32>
    %c13 = arith.constant 13 : index
    %73 = memref.load %arg2[%c13] : memref<107xf32, #tpu.memory_space<smem>>
    %74 = vector.broadcast %73 : f32 to vector<1x8x128xf32>
    %75 = arith.mulf %74, %11 : vector<1x8x128xf32>
    %76 = arith.addf %72, %75 : vector<1x8x128xf32>
    %c14 = arith.constant 14 : index
    %77 = memref.load %arg2[%c14] : memref<107xf32, #tpu.memory_space<smem>>
    %78 = vector.broadcast %77 : f32 to vector<1x8x128xf32>
    %79 = arith.mulf %78, %13 : vector<1x8x128xf32>
    %80 = arith.addf %76, %79 : vector<1x8x128xf32>
    %c15 = arith.constant 15 : index
    %81 = memref.load %arg2[%c15] : memref<107xf32, #tpu.memory_space<smem>>
    %82 = vector.broadcast %81 : f32 to vector<1x8x128xf32>
    %83 = arith.mulf %82, %15 : vector<1x8x128xf32>
    %84 = arith.addf %80, %83 : vector<1x8x128xf32>
    %c16 = arith.constant 16 : index
    %85 = memref.load %arg2[%c16] : memref<107xf32, #tpu.memory_space<smem>>
    %86 = vector.broadcast %85 : f32 to vector<1x8x128xf32>
    %87 = arith.mulf %86, %17 : vector<1x8x128xf32>
    %88 = arith.addf %84, %87 : vector<1x8x128xf32>
    %c17 = arith.constant 17 : index
    %89 = memref.load %arg2[%c17] : memref<107xf32, #tpu.memory_space<smem>>
    %90 = vector.broadcast %89 : f32 to vector<1x8x128xf32>
    %91 = arith.mulf %90, %19 : vector<1x8x128xf32>
    %92 = arith.addf %88, %91 : vector<1x8x128xf32>
    %c37 = arith.constant 37 : index
    %93 = memref.load %arg2[%c37] : memref<107xf32, #tpu.memory_space<smem>>
    %94 = vector.broadcast %93 : f32 to vector<1x8x128xf32>
    %95 = arith.addf %92, %94 : vector<1x8x128xf32>
    %c18 = arith.constant 18 : index
    %96 = memref.load %arg2[%c18] : memref<107xf32, #tpu.memory_space<smem>>
    %97 = vector.broadcast %96 : f32 to vector<1x8x128xf32>
    %98 = arith.mulf %97, %3 : vector<1x8x128xf32>
    %c19 = arith.constant 19 : index
    %99 = memref.load %arg2[%c19] : memref<107xf32, #tpu.memory_space<smem>>
    %100 = vector.broadcast %99 : f32 to vector<1x8x128xf32>
    %101 = arith.mulf %100, %5 : vector<1x8x128xf32>
    %102 = arith.addf %98, %101 : vector<1x8x128xf32>
    %c20 = arith.constant 20 : index
    %103 = memref.load %arg2[%c20] : memref<107xf32, #tpu.memory_space<smem>>
    %104 = vector.broadcast %103 : f32 to vector<1x8x128xf32>
    %105 = arith.mulf %104, %7 : vector<1x8x128xf32>
    %106 = arith.addf %102, %105 : vector<1x8x128xf32>
    %c21 = arith.constant 21 : index
    %107 = memref.load %arg2[%c21] : memref<107xf32, #tpu.memory_space<smem>>
    %108 = vector.broadcast %107 : f32 to vector<1x8x128xf32>
    %109 = arith.mulf %108, %9 : vector<1x8x128xf32>
    %110 = arith.addf %106, %109 : vector<1x8x128xf32>
    %c22 = arith.constant 22 : index
    %111 = memref.load %arg2[%c22] : memref<107xf32, #tpu.memory_space<smem>>
    %112 = vector.broadcast %111 : f32 to vector<1x8x128xf32>
    %113 = arith.mulf %112, %11 : vector<1x8x128xf32>
    %114 = arith.addf %110, %113 : vector<1x8x128xf32>
    %c23 = arith.constant 23 : index
    %115 = memref.load %arg2[%c23] : memref<107xf32, #tpu.memory_space<smem>>
    %116 = vector.broadcast %115 : f32 to vector<1x8x128xf32>
    %117 = arith.mulf %116, %13 : vector<1x8x128xf32>
    %118 = arith.addf %114, %117 : vector<1x8x128xf32>
    %c24 = arith.constant 24 : index
    %119 = memref.load %arg2[%c24] : memref<107xf32, #tpu.memory_space<smem>>
    %120 = vector.broadcast %119 : f32 to vector<1x8x128xf32>
    %121 = arith.mulf %120, %15 : vector<1x8x128xf32>
    %122 = arith.addf %118, %121 : vector<1x8x128xf32>
    %c25 = arith.constant 25 : index
    %123 = memref.load %arg2[%c25] : memref<107xf32, #tpu.memory_space<smem>>
    %124 = vector.broadcast %123 : f32 to vector<1x8x128xf32>
    %125 = arith.mulf %124, %17 : vector<1x8x128xf32>
    %126 = arith.addf %122, %125 : vector<1x8x128xf32>
    %c26 = arith.constant 26 : index
    %127 = memref.load %arg2[%c26] : memref<107xf32, #tpu.memory_space<smem>>
    %128 = vector.broadcast %127 : f32 to vector<1x8x128xf32>
    %129 = arith.mulf %128, %19 : vector<1x8x128xf32>
    %130 = arith.addf %126, %129 : vector<1x8x128xf32>
    %c38 = arith.constant 38 : index
    %131 = memref.load %arg2[%c38] : memref<107xf32, #tpu.memory_space<smem>>
    %132 = vector.broadcast %131 : f32 to vector<1x8x128xf32>
    %133 = arith.addf %130, %132 : vector<1x8x128xf32>
    %c27 = arith.constant 27 : index
    %134 = memref.load %arg2[%c27] : memref<107xf32, #tpu.memory_space<smem>>
    %135 = vector.broadcast %134 : f32 to vector<1x8x128xf32>
    %136 = arith.mulf %135, %3 : vector<1x8x128xf32>
    %c28 = arith.constant 28 : index
    %137 = memref.load %arg2[%c28] : memref<107xf32, #tpu.memory_space<smem>>
    %138 = vector.broadcast %137 : f32 to vector<1x8x128xf32>
    %139 = arith.mulf %138, %5 : vector<1x8x128xf32>
    %140 = arith.addf %136, %139 : vector<1x8x128xf32>
    %c29 = arith.constant 29 : index
    %141 = memref.load %arg2[%c29] : memref<107xf32, #tpu.memory_space<smem>>
    %142 = vector.broadcast %141 : f32 to vector<1x8x128xf32>
    %143 = arith.mulf %142, %7 : vector<1x8x128xf32>
    %144 = arith.addf %140, %143 : vector<1x8x128xf32>
    %c30 = arith.constant 30 : index
    %145 = memref.load %arg2[%c30] : memref<107xf32, #tpu.memory_space<smem>>
    %146 = vector.broadcast %145 : f32 to vector<1x8x128xf32>
    %147 = arith.mulf %146, %9 : vector<1x8x128xf32>
    %148 = arith.addf %144, %147 : vector<1x8x128xf32>
    %c31 = arith.constant 31 : index
    %149 = memref.load %arg2[%c31] : memref<107xf32, #tpu.memory_space<smem>>
    %150 = vector.broadcast %149 : f32 to vector<1x8x128xf32>
    %151 = arith.mulf %150, %11 : vector<1x8x128xf32>
    %152 = arith.addf %148, %151 : vector<1x8x128xf32>
    %c32 = arith.constant 32 : index
    %153 = memref.load %arg2[%c32] : memref<107xf32, #tpu.memory_space<smem>>
    %154 = vector.broadcast %153 : f32 to vector<1x8x128xf32>
    %155 = arith.mulf %154, %13 : vector<1x8x128xf32>
    %156 = arith.addf %152, %155 : vector<1x8x128xf32>
    %c33 = arith.constant 33 : index
    %157 = memref.load %arg2[%c33] : memref<107xf32, #tpu.memory_space<smem>>
    %158 = vector.broadcast %157 : f32 to vector<1x8x128xf32>
    %159 = arith.mulf %158, %15 : vector<1x8x128xf32>
    %160 = arith.addf %156, %159 : vector<1x8x128xf32>
    %c34 = arith.constant 34 : index
    %161 = memref.load %arg2[%c34] : memref<107xf32, #tpu.memory_space<smem>>
    %162 = vector.broadcast %161 : f32 to vector<1x8x128xf32>
    %163 = arith.mulf %162, %17 : vector<1x8x128xf32>
    %164 = arith.addf %160, %163 : vector<1x8x128xf32>
    %c35 = arith.constant 35 : index
    %165 = memref.load %arg2[%c35] : memref<107xf32, #tpu.memory_space<smem>>
    %166 = vector.broadcast %165 : f32 to vector<1x8x128xf32>
    %167 = arith.mulf %166, %19 : vector<1x8x128xf32>
    %168 = arith.addf %164, %167 : vector<1x8x128xf32>
    %c39 = arith.constant 39 : index
    %169 = memref.load %arg2[%c39] : memref<107xf32, #tpu.memory_space<smem>>
    %170 = vector.broadcast %169 : f32 to vector<1x8x128xf32>
    %171 = arith.addf %168, %170 : vector<1x8x128xf32>
    %cst = arith.constant 0.000000e+00 : f32
    %172 = vector.broadcast %cst : f32 to vector<1x8x128xf32>
    %173 = arith.maximumf %57, %172 : vector<1x8x128xf32>
    %cst_18 = arith.constant 0.000000e+00 : f32
    %174 = vector.broadcast %cst_18 : f32 to vector<1x8x128xf32>
    %175 = arith.maximumf %95, %174 : vector<1x8x128xf32>
    %cst_19 = arith.constant 0.000000e+00 : f32
    %176 = vector.broadcast %cst_19 : f32 to vector<1x8x128xf32>
    %177 = arith.maximumf %133, %176 : vector<1x8x128xf32>
    %cst_20 = arith.constant 0.000000e+00 : f32
    %178 = vector.broadcast %cst_20 : f32 to vector<1x8x128xf32>
    %179 = arith.maximumf %171, %178 : vector<1x8x128xf32>
    %c40 = arith.constant 40 : index
    %180 = memref.load %arg2[%c40] : memref<107xf32, #tpu.memory_space<smem>>
    %181 = vector.broadcast %180 : f32 to vector<1x8x128xf32>
    %182 = arith.mulf %181, %173 : vector<1x8x128xf32>
    %c41 = arith.constant 41 : index
    %183 = memref.load %arg2[%c41] : memref<107xf32, #tpu.memory_space<smem>>
    %184 = vector.broadcast %183 : f32 to vector<1x8x128xf32>
    %185 = arith.mulf %184, %175 : vector<1x8x128xf32>
    %186 = arith.addf %182, %185 : vector<1x8x128xf32>
    %c42 = arith.constant 42 : index
    %187 = memref.load %arg2[%c42] : memref<107xf32, #tpu.memory_space<smem>>
    %188 = vector.broadcast %187 : f32 to vector<1x8x128xf32>
    %189 = arith.mulf %188, %177 : vector<1x8x128xf32>
    %190 = arith.addf %186, %189 : vector<1x8x128xf32>
    %c43 = arith.constant 43 : index
    %191 = memref.load %arg2[%c43] : memref<107xf32, #tpu.memory_space<smem>>
    %192 = vector.broadcast %191 : f32 to vector<1x8x128xf32>
    %193 = arith.mulf %192, %179 : vector<1x8x128xf32>
    %194 = arith.addf %190, %193 : vector<1x8x128xf32>
    %c48 = arith.constant 48 : index
    %195 = memref.load %arg2[%c48] : memref<107xf32, #tpu.memory_space<smem>>
    %196 = vector.broadcast %195 : f32 to vector<1x8x128xf32>
    %197 = arith.addf %194, %196 : vector<1x8x128xf32>
    %c44 = arith.constant 44 : index
    %198 = memref.load %arg2[%c44] : memref<107xf32, #tpu.memory_space<smem>>
    %199 = vector.broadcast %198 : f32 to vector<1x8x128xf32>
    %200 = arith.mulf %199, %173 : vector<1x8x128xf32>
    %c45 = arith.constant 45 : index
    %201 = memref.load %arg2[%c45] : memref<107xf32, #tpu.memory_space<smem>>
    %202 = vector.broadcast %201 : f32 to vector<1x8x128xf32>
    %203 = arith.mulf %202, %175 : vector<1x8x128xf32>
    %204 = arith.addf %200, %203 : vector<1x8x128xf32>
    %c46 = arith.constant 46 : index
    %205 = memref.load %arg2[%c46] : memref<107xf32, #tpu.memory_space<smem>>
    %206 = vector.broadcast %205 : f32 to vector<1x8x128xf32>
    %207 = arith.mulf %206, %177 : vector<1x8x128xf32>
    %208 = arith.addf %204, %207 : vector<1x8x128xf32>
    %c47 = arith.constant 47 : index
    %209 = memref.load %arg2[%c47] : memref<107xf32, #tpu.memory_space<smem>>
    %210 = vector.broadcast %209 : f32 to vector<1x8x128xf32>
    %211 = arith.mulf %210, %179 : vector<1x8x128xf32>
    %212 = arith.addf %208, %211 : vector<1x8x128xf32>
    %c49 = arith.constant 49 : index
    %213 = memref.load %arg2[%c49] : memref<107xf32, #tpu.memory_space<smem>>
    %214 = vector.broadcast %213 : f32 to vector<1x8x128xf32>
    %215 = arith.addf %212, %214 : vector<1x8x128xf32>
    %cst_21 = arith.constant 0.000000e+00 : f32
    %216 = vector.broadcast %cst_21 : f32 to vector<1x8x128xf32>
    %217 = arith.maximumf %197, %216 : vector<1x8x128xf32>
    %cst_22 = arith.constant 0.000000e+00 : f32
    %218 = vector.broadcast %cst_22 : f32 to vector<1x8x128xf32>
    %219 = arith.maximumf %215, %218 : vector<1x8x128xf32>
    %c50 = arith.constant 50 : index
    %220 = memref.load %arg2[%c50] : memref<107xf32, #tpu.memory_space<smem>>
    %221 = vector.broadcast %220 : f32 to vector<1x8x128xf32>
    %222 = arith.mulf %221, %217 : vector<1x8x128xf32>
    %c51 = arith.constant 51 : index
    %223 = memref.load %arg2[%c51] : memref<107xf32, #tpu.memory_space<smem>>
    %224 = vector.broadcast %223 : f32 to vector<1x8x128xf32>
    %225 = arith.mulf %224, %219 : vector<1x8x128xf32>
    %226 = arith.addf %222, %225 : vector<1x8x128xf32>
    %c58 = arith.constant 58 : index
    %227 = memref.load %arg2[%c58] : memref<107xf32, #tpu.memory_space<smem>>
    %228 = vector.broadcast %227 : f32 to vector<1x8x128xf32>
    %229 = arith.addf %226, %228 : vector<1x8x128xf32>
    %c52 = arith.constant 52 : index
    %230 = memref.load %arg2[%c52] : memref<107xf32, #tpu.memory_space<smem>>
    %231 = vector.broadcast %230 : f32 to vector<1x8x128xf32>
    %232 = arith.mulf %231, %217 : vector<1x8x128xf32>
    %c53 = arith.constant 53 : index
    %233 = memref.load %arg2[%c53] : memref<107xf32, #tpu.memory_space<smem>>
    %234 = vector.broadcast %233 : f32 to vector<1x8x128xf32>
    %235 = arith.mulf %234, %219 : vector<1x8x128xf32>
    %236 = arith.addf %232, %235 : vector<1x8x128xf32>
    %c59 = arith.constant 59 : index
    %237 = memref.load %arg2[%c59] : memref<107xf32, #tpu.memory_space<smem>>
    %238 = vector.broadcast %237 : f32 to vector<1x8x128xf32>
    %239 = arith.addf %236, %238 : vector<1x8x128xf32>
    %c54 = arith.constant 54 : index
    %240 = memref.load %arg2[%c54] : memref<107xf32, #tpu.memory_space<smem>>
    %241 = vector.broadcast %240 : f32 to vector<1x8x128xf32>
    %242 = arith.mulf %241, %217 : vector<1x8x128xf32>
    %c55 = arith.constant 55 : index
    %243 = memref.load %arg2[%c55] : memref<107xf32, #tpu.memory_space<smem>>
    %244 = vector.broadcast %243 : f32 to vector<1x8x128xf32>
    %245 = arith.mulf %244, %219 : vector<1x8x128xf32>
    %246 = arith.addf %242, %245 : vector<1x8x128xf32>
    %c60 = arith.constant 60 : index
    %247 = memref.load %arg2[%c60] : memref<107xf32, #tpu.memory_space<smem>>
    %248 = vector.broadcast %247 : f32 to vector<1x8x128xf32>
    %249 = arith.addf %246, %248 : vector<1x8x128xf32>
    %c56 = arith.constant 56 : index
    %250 = memref.load %arg2[%c56] : memref<107xf32, #tpu.memory_space<smem>>
    %251 = vector.broadcast %250 : f32 to vector<1x8x128xf32>
    %252 = arith.mulf %251, %217 : vector<1x8x128xf32>
    %c57 = arith.constant 57 : index
    %253 = memref.load %arg2[%c57] : memref<107xf32, #tpu.memory_space<smem>>
    %254 = vector.broadcast %253 : f32 to vector<1x8x128xf32>
    %255 = arith.mulf %254, %219 : vector<1x8x128xf32>
    %256 = arith.addf %252, %255 : vector<1x8x128xf32>
    %c61 = arith.constant 61 : index
    %257 = memref.load %arg2[%c61] : memref<107xf32, #tpu.memory_space<smem>>
    %258 = vector.broadcast %257 : f32 to vector<1x8x128xf32>
    %259 = arith.addf %256, %258 : vector<1x8x128xf32>
    %cst_23 = arith.constant 0.000000e+00 : f32
    %260 = vector.broadcast %cst_23 : f32 to vector<1x8x128xf32>
    %261 = arith.maximumf %229, %260 : vector<1x8x128xf32>
    %cst_24 = arith.constant 0.000000e+00 : f32
    %262 = vector.broadcast %cst_24 : f32 to vector<1x8x128xf32>
    %263 = arith.maximumf %239, %262 : vector<1x8x128xf32>
    %cst_25 = arith.constant 0.000000e+00 : f32
    %264 = vector.broadcast %cst_25 : f32 to vector<1x8x128xf32>
    %265 = arith.maximumf %249, %264 : vector<1x8x128xf32>
    %cst_26 = arith.constant 0.000000e+00 : f32
    %266 = vector.broadcast %cst_26 : f32 to vector<1x8x128xf32>
    %267 = arith.maximumf %259, %266 : vector<1x8x128xf32>
    %c62 = arith.constant 62 : index
    %268 = memref.load %arg2[%c62] : memref<107xf32, #tpu.memory_space<smem>>
    %269 = vector.broadcast %268 : f32 to vector<1x8x128xf32>
    %270 = arith.mulf %269, %261 : vector<1x8x128xf32>
    %c63 = arith.constant 63 : index
    %271 = memref.load %arg2[%c63] : memref<107xf32, #tpu.memory_space<smem>>
    %272 = vector.broadcast %271 : f32 to vector<1x8x128xf32>
    %273 = arith.mulf %272, %263 : vector<1x8x128xf32>
    %274 = arith.addf %270, %273 : vector<1x8x128xf32>
    %c64 = arith.constant 64 : index
    %275 = memref.load %arg2[%c64] : memref<107xf32, #tpu.memory_space<smem>>
    %276 = vector.broadcast %275 : f32 to vector<1x8x128xf32>
    %277 = arith.mulf %276, %265 : vector<1x8x128xf32>
    %278 = arith.addf %274, %277 : vector<1x8x128xf32>
    %c65 = arith.constant 65 : index
    %279 = memref.load %arg2[%c65] : memref<107xf32, #tpu.memory_space<smem>>
    %280 = vector.broadcast %279 : f32 to vector<1x8x128xf32>
    %281 = arith.mulf %280, %267 : vector<1x8x128xf32>
    %282 = arith.addf %278, %281 : vector<1x8x128xf32>
    %c98 = arith.constant 98 : index
    %283 = memref.load %arg2[%c98] : memref<107xf32, #tpu.memory_space<smem>>
    %284 = vector.broadcast %283 : f32 to vector<1x8x128xf32>
    %285 = arith.addf %282, %284 : vector<1x8x128xf32>
    %c66 = arith.constant 66 : index
    %286 = memref.load %arg2[%c66] : memref<107xf32, #tpu.memory_space<smem>>
    %287 = vector.broadcast %286 : f32 to vector<1x8x128xf32>
    %288 = arith.mulf %287, %261 : vector<1x8x128xf32>
    %c67 = arith.constant 67 : index
    %289 = memref.load %arg2[%c67] : memref<107xf32, #tpu.memory_space<smem>>
    %290 = vector.broadcast %289 : f32 to vector<1x8x128xf32>
    %291 = arith.mulf %290, %263 : vector<1x8x128xf32>
    %292 = arith.addf %288, %291 : vector<1x8x128xf32>
    %c68 = arith.constant 68 : index
    %293 = memref.load %arg2[%c68] : memref<107xf32, #tpu.memory_space<smem>>
    %294 = vector.broadcast %293 : f32 to vector<1x8x128xf32>
    %295 = arith.mulf %294, %265 : vector<1x8x128xf32>
    %296 = arith.addf %292, %295 : vector<1x8x128xf32>
    %c69 = arith.constant 69 : index
    %297 = memref.load %arg2[%c69] : memref<107xf32, #tpu.memory_space<smem>>
    %298 = vector.broadcast %297 : f32 to vector<1x8x128xf32>
    %299 = arith.mulf %298, %267 : vector<1x8x128xf32>
    %300 = arith.addf %296, %299 : vector<1x8x128xf32>
    %c99 = arith.constant 99 : index
    %301 = memref.load %arg2[%c99] : memref<107xf32, #tpu.memory_space<smem>>
    %302 = vector.broadcast %301 : f32 to vector<1x8x128xf32>
    %303 = arith.addf %300, %302 : vector<1x8x128xf32>
    %c70 = arith.constant 70 : index
    %304 = memref.load %arg2[%c70] : memref<107xf32, #tpu.memory_space<smem>>
    %305 = vector.broadcast %304 : f32 to vector<1x8x128xf32>
    %306 = arith.mulf %305, %261 : vector<1x8x128xf32>
    %c71 = arith.constant 71 : index
    %307 = memref.load %arg2[%c71] : memref<107xf32, #tpu.memory_space<smem>>
    %308 = vector.broadcast %307 : f32 to vector<1x8x128xf32>
    %309 = arith.mulf %308, %263 : vector<1x8x128xf32>
    %310 = arith.addf %306, %309 : vector<1x8x128xf32>
    %c72 = arith.constant 72 : index
    %311 = memref.load %arg2[%c72] : memref<107xf32, #tpu.memory_space<smem>>
    %312 = vector.broadcast %311 : f32 to vector<1x8x128xf32>
    %313 = arith.mulf %312, %265 : vector<1x8x128xf32>
    %314 = arith.addf %310, %313 : vector<1x8x128xf32>
    %c73 = arith.constant 73 : index
    %315 = memref.load %arg2[%c73] : memref<107xf32, #tpu.memory_space<smem>>
    %316 = vector.broadcast %315 : f32 to vector<1x8x128xf32>
    %317 = arith.mulf %316, %267 : vector<1x8x128xf32>
    %318 = arith.addf %314, %317 : vector<1x8x128xf32>
    %c100 = arith.constant 100 : index
    %319 = memref.load %arg2[%c100] : memref<107xf32, #tpu.memory_space<smem>>
    %320 = vector.broadcast %319 : f32 to vector<1x8x128xf32>
    %321 = arith.addf %318, %320 : vector<1x8x128xf32>
    %c74 = arith.constant 74 : index
    %322 = memref.load %arg2[%c74] : memref<107xf32, #tpu.memory_space<smem>>
    %323 = vector.broadcast %322 : f32 to vector<1x8x128xf32>
    %324 = arith.mulf %323, %261 : vector<1x8x128xf32>
    %c75 = arith.constant 75 : index
    %325 = memref.load %arg2[%c75] : memref<107xf32, #tpu.memory_space<smem>>
    %326 = vector.broadcast %325 : f32 to vector<1x8x128xf32>
    %327 = arith.mulf %326, %263 : vector<1x8x128xf32>
    %328 = arith.addf %324, %327 : vector<1x8x128xf32>
    %c76 = arith.constant 76 : index
    %329 = memref.load %arg2[%c76] : memref<107xf32, #tpu.memory_space<smem>>
    %330 = vector.broadcast %329 : f32 to vector<1x8x128xf32>
    %331 = arith.mulf %330, %265 : vector<1x8x128xf32>
    %332 = arith.addf %328, %331 : vector<1x8x128xf32>
    %c77 = arith.constant 77 : index
    %333 = memref.load %arg2[%c77] : memref<107xf32, #tpu.memory_space<smem>>
    %334 = vector.broadcast %333 : f32 to vector<1x8x128xf32>
    %335 = arith.mulf %334, %267 : vector<1x8x128xf32>
    %336 = arith.addf %332, %335 : vector<1x8x128xf32>
    %c101 = arith.constant 101 : index
    %337 = memref.load %arg2[%c101] : memref<107xf32, #tpu.memory_space<smem>>
    %338 = vector.broadcast %337 : f32 to vector<1x8x128xf32>
    %339 = arith.addf %336, %338 : vector<1x8x128xf32>
    %c78 = arith.constant 78 : index
    %340 = memref.load %arg2[%c78] : memref<107xf32, #tpu.memory_space<smem>>
    %341 = vector.broadcast %340 : f32 to vector<1x8x128xf32>
    %342 = arith.mulf %341, %261 : vector<1x8x128xf32>
    %c79 = arith.constant 79 : index
    %343 = memref.load %arg2[%c79] : memref<107xf32, #tpu.memory_space<smem>>
    %344 = vector.broadcast %343 : f32 to vector<1x8x128xf32>
    %345 = arith.mulf %344, %263 : vector<1x8x128xf32>
    %346 = arith.addf %342, %345 : vector<1x8x128xf32>
    %c80 = arith.constant 80 : index
    %347 = memref.load %arg2[%c80] : memref<107xf32, #tpu.memory_space<smem>>
    %348 = vector.broadcast %347 : f32 to vector<1x8x128xf32>
    %349 = arith.mulf %348, %265 : vector<1x8x128xf32>
    %350 = arith.addf %346, %349 : vector<1x8x128xf32>
    %c81 = arith.constant 81 : index
    %351 = memref.load %arg2[%c81] : memref<107xf32, #tpu.memory_space<smem>>
    %352 = vector.broadcast %351 : f32 to vector<1x8x128xf32>
    %353 = arith.mulf %352, %267 : vector<1x8x128xf32>
    %354 = arith.addf %350, %353 : vector<1x8x128xf32>
    %c102 = arith.constant 102 : index
    %355 = memref.load %arg2[%c102] : memref<107xf32, #tpu.memory_space<smem>>
    %356 = vector.broadcast %355 : f32 to vector<1x8x128xf32>
    %357 = arith.addf %354, %356 : vector<1x8x128xf32>
    %c82 = arith.constant 82 : index
    %358 = memref.load %arg2[%c82] : memref<107xf32, #tpu.memory_space<smem>>
    %359 = vector.broadcast %358 : f32 to vector<1x8x128xf32>
    %360 = arith.mulf %359, %261 : vector<1x8x128xf32>
    %c83 = arith.constant 83 : index
    %361 = memref.load %arg2[%c83] : memref<107xf32, #tpu.memory_space<smem>>
    %362 = vector.broadcast %361 : f32 to vector<1x8x128xf32>
    %363 = arith.mulf %362, %263 : vector<1x8x128xf32>
    %364 = arith.addf %360, %363 : vector<1x8x128xf32>
    %c84 = arith.constant 84 : index
    %365 = memref.load %arg2[%c84] : memref<107xf32, #tpu.memory_space<smem>>
    %366 = vector.broadcast %365 : f32 to vector<1x8x128xf32>
    %367 = arith.mulf %366, %265 : vector<1x8x128xf32>
    %368 = arith.addf %364, %367 : vector<1x8x128xf32>
    %c85 = arith.constant 85 : index
    %369 = memref.load %arg2[%c85] : memref<107xf32, #tpu.memory_space<smem>>
    %370 = vector.broadcast %369 : f32 to vector<1x8x128xf32>
    %371 = arith.mulf %370, %267 : vector<1x8x128xf32>
    %372 = arith.addf %368, %371 : vector<1x8x128xf32>
    %c103 = arith.constant 103 : index
    %373 = memref.load %arg2[%c103] : memref<107xf32, #tpu.memory_space<smem>>
    %374 = vector.broadcast %373 : f32 to vector<1x8x128xf32>
    %375 = arith.addf %372, %374 : vector<1x8x128xf32>
    %c86 = arith.constant 86 : index
    %376 = memref.load %arg2[%c86] : memref<107xf32, #tpu.memory_space<smem>>
    %377 = vector.broadcast %376 : f32 to vector<1x8x128xf32>
    %378 = arith.mulf %377, %261 : vector<1x8x128xf32>
    %c87 = arith.constant 87 : index
    %379 = memref.load %arg2[%c87] : memref<107xf32, #tpu.memory_space<smem>>
    %380 = vector.broadcast %379 : f32 to vector<1x8x128xf32>
    %381 = arith.mulf %380, %263 : vector<1x8x128xf32>
    %382 = arith.addf %378, %381 : vector<1x8x128xf32>
    %c88 = arith.constant 88 : index
    %383 = memref.load %arg2[%c88] : memref<107xf32, #tpu.memory_space<smem>>
    %384 = vector.broadcast %383 : f32 to vector<1x8x128xf32>
    %385 = arith.mulf %384, %265 : vector<1x8x128xf32>
    %386 = arith.addf %382, %385 : vector<1x8x128xf32>
    %c89 = arith.constant 89 : index
    %387 = memref.load %arg2[%c89] : memref<107xf32, #tpu.memory_space<smem>>
    %388 = vector.broadcast %387 : f32 to vector<1x8x128xf32>
    %389 = arith.mulf %388, %267 : vector<1x8x128xf32>
    %390 = arith.addf %386, %389 : vector<1x8x128xf32>
    %c104 = arith.constant 104 : index
    %391 = memref.load %arg2[%c104] : memref<107xf32, #tpu.memory_space<smem>>
    %392 = vector.broadcast %391 : f32 to vector<1x8x128xf32>
    %393 = arith.addf %390, %392 : vector<1x8x128xf32>
    %c90 = arith.constant 90 : index
    %394 = memref.load %arg2[%c90] : memref<107xf32, #tpu.memory_space<smem>>
    %395 = vector.broadcast %394 : f32 to vector<1x8x128xf32>
    %396 = arith.mulf %395, %261 : vector<1x8x128xf32>
    %c91 = arith.constant 91 : index
    %397 = memref.load %arg2[%c91] : memref<107xf32, #tpu.memory_space<smem>>
    %398 = vector.broadcast %397 : f32 to vector<1x8x128xf32>
    %399 = arith.mulf %398, %263 : vector<1x8x128xf32>
    %400 = arith.addf %396, %399 : vector<1x8x128xf32>
    %c92 = arith.constant 92 : index
    %401 = memref.load %arg2[%c92] : memref<107xf32, #tpu.memory_space<smem>>
    %402 = vector.broadcast %401 : f32 to vector<1x8x128xf32>
    %403 = arith.mulf %402, %265 : vector<1x8x128xf32>
    %404 = arith.addf %400, %403 : vector<1x8x128xf32>
    %c93 = arith.constant 93 : index
    %405 = memref.load %arg2[%c93] : memref<107xf32, #tpu.memory_space<smem>>
    %406 = vector.broadcast %405 : f32 to vector<1x8x128xf32>
    %407 = arith.mulf %406, %267 : vector<1x8x128xf32>
    %408 = arith.addf %404, %407 : vector<1x8x128xf32>
    %c105 = arith.constant 105 : index
    %409 = memref.load %arg2[%c105] : memref<107xf32, #tpu.memory_space<smem>>
    %410 = vector.broadcast %409 : f32 to vector<1x8x128xf32>
    %411 = arith.addf %408, %410 : vector<1x8x128xf32>
    %c94 = arith.constant 94 : index
    %412 = memref.load %arg2[%c94] : memref<107xf32, #tpu.memory_space<smem>>
    %413 = vector.broadcast %412 : f32 to vector<1x8x128xf32>
    %414 = arith.mulf %413, %261 : vector<1x8x128xf32>
    %c95 = arith.constant 95 : index
    %415 = memref.load %arg2[%c95] : memref<107xf32, #tpu.memory_space<smem>>
    %416 = vector.broadcast %415 : f32 to vector<1x8x128xf32>
    %417 = arith.mulf %416, %263 : vector<1x8x128xf32>
    %418 = arith.addf %414, %417 : vector<1x8x128xf32>
    %c96 = arith.constant 96 : index
    %419 = memref.load %arg2[%c96] : memref<107xf32, #tpu.memory_space<smem>>
    %420 = vector.broadcast %419 : f32 to vector<1x8x128xf32>
    %421 = arith.mulf %420, %265 : vector<1x8x128xf32>
    %422 = arith.addf %418, %421 : vector<1x8x128xf32>
    %c97 = arith.constant 97 : index
    %423 = memref.load %arg2[%c97] : memref<107xf32, #tpu.memory_space<smem>>
    %424 = vector.broadcast %423 : f32 to vector<1x8x128xf32>
    %425 = arith.mulf %424, %267 : vector<1x8x128xf32>
    %426 = arith.addf %422, %425 : vector<1x8x128xf32>
    %c106 = arith.constant 106 : index
    %427 = memref.load %arg2[%c106] : memref<107xf32, #tpu.memory_space<smem>>
    %428 = vector.broadcast %427 : f32 to vector<1x8x128xf32>
    %429 = arith.addf %426, %428 : vector<1x8x128xf32>
    %cst_27 = arith.constant 5.000000e-01 : f32
    %430 = vector.broadcast %cst_27 : f32 to vector<1x8x128xf32>
    %431 = arith.mulf %430, %285 : vector<1x8x128xf32>
    %432 = math.tanh %431 : vector<1x8x128xf32>
    %cst_28 = arith.constant 5.000000e-01 : f32
    %433 = vector.broadcast %cst_28 : f32 to vector<1x8x128xf32>
    %434 = arith.mulf %433, %432 : vector<1x8x128xf32>
    %cst_29 = arith.constant 5.000000e-01 : f32
    %435 = vector.broadcast %cst_29 : f32 to vector<1x8x128xf32>
    %436 = arith.addf %434, %435 : vector<1x8x128xf32>
    %cst_30 = arith.constant 5.000000e-01 : f32
    %437 = vector.broadcast %cst_30 : f32 to vector<1x8x128xf32>
    %438 = arith.mulf %437, %303 : vector<1x8x128xf32>
    %439 = math.tanh %438 : vector<1x8x128xf32>
    %cst_31 = arith.constant 5.000000e-01 : f32
    %440 = vector.broadcast %cst_31 : f32 to vector<1x8x128xf32>
    %441 = arith.mulf %440, %439 : vector<1x8x128xf32>
    %cst_32 = arith.constant 5.000000e-01 : f32
    %442 = vector.broadcast %cst_32 : f32 to vector<1x8x128xf32>
    %443 = arith.addf %441, %442 : vector<1x8x128xf32>
    %cst_33 = arith.constant 5.000000e-01 : f32
    %444 = vector.broadcast %cst_33 : f32 to vector<1x8x128xf32>
    %445 = arith.mulf %444, %321 : vector<1x8x128xf32>
    %446 = math.tanh %445 : vector<1x8x128xf32>
    %cst_34 = arith.constant 5.000000e-01 : f32
    %447 = vector.broadcast %cst_34 : f32 to vector<1x8x128xf32>
    %448 = arith.mulf %447, %446 : vector<1x8x128xf32>
    %cst_35 = arith.constant 5.000000e-01 : f32
    %449 = vector.broadcast %cst_35 : f32 to vector<1x8x128xf32>
    %450 = arith.addf %448, %449 : vector<1x8x128xf32>
    %cst_36 = arith.constant 5.000000e-01 : f32
    %451 = vector.broadcast %cst_36 : f32 to vector<1x8x128xf32>
    %452 = arith.mulf %451, %339 : vector<1x8x128xf32>
    %453 = math.tanh %452 : vector<1x8x128xf32>
    %cst_37 = arith.constant 5.000000e-01 : f32
    %454 = vector.broadcast %cst_37 : f32 to vector<1x8x128xf32>
    %455 = arith.mulf %454, %453 : vector<1x8x128xf32>
    %cst_38 = arith.constant 5.000000e-01 : f32
    %456 = vector.broadcast %cst_38 : f32 to vector<1x8x128xf32>
    %457 = arith.addf %455, %456 : vector<1x8x128xf32>
    %cst_39 = arith.constant 5.000000e-01 : f32
    %458 = vector.broadcast %cst_39 : f32 to vector<1x8x128xf32>
    %459 = arith.mulf %458, %357 : vector<1x8x128xf32>
    %460 = math.tanh %459 : vector<1x8x128xf32>
    %cst_40 = arith.constant 5.000000e-01 : f32
    %461 = vector.broadcast %cst_40 : f32 to vector<1x8x128xf32>
    %462 = arith.mulf %461, %460 : vector<1x8x128xf32>
    %cst_41 = arith.constant 5.000000e-01 : f32
    %463 = vector.broadcast %cst_41 : f32 to vector<1x8x128xf32>
    %464 = arith.addf %462, %463 : vector<1x8x128xf32>
    %cst_42 = arith.constant 5.000000e-01 : f32
    %465 = vector.broadcast %cst_42 : f32 to vector<1x8x128xf32>
    %466 = arith.mulf %465, %375 : vector<1x8x128xf32>
    %467 = math.tanh %466 : vector<1x8x128xf32>
    %cst_43 = arith.constant 5.000000e-01 : f32
    %468 = vector.broadcast %cst_43 : f32 to vector<1x8x128xf32>
    %469 = arith.mulf %468, %467 : vector<1x8x128xf32>
    %cst_44 = arith.constant 5.000000e-01 : f32
    %470 = vector.broadcast %cst_44 : f32 to vector<1x8x128xf32>
    %471 = arith.addf %469, %470 : vector<1x8x128xf32>
    %cst_45 = arith.constant 5.000000e-01 : f32
    %472 = vector.broadcast %cst_45 : f32 to vector<1x8x128xf32>
    %473 = arith.mulf %472, %393 : vector<1x8x128xf32>
    %474 = math.tanh %473 : vector<1x8x128xf32>
    %cst_46 = arith.constant 5.000000e-01 : f32
    %475 = vector.broadcast %cst_46 : f32 to vector<1x8x128xf32>
    %476 = arith.mulf %475, %474 : vector<1x8x128xf32>
    %cst_47 = arith.constant 5.000000e-01 : f32
    %477 = vector.broadcast %cst_47 : f32 to vector<1x8x128xf32>
    %478 = arith.addf %476, %477 : vector<1x8x128xf32>
    %cst_48 = arith.constant 5.000000e-01 : f32
    %479 = vector.broadcast %cst_48 : f32 to vector<1x8x128xf32>
    %480 = arith.mulf %479, %411 : vector<1x8x128xf32>
    %481 = math.tanh %480 : vector<1x8x128xf32>
    %cst_49 = arith.constant 5.000000e-01 : f32
    %482 = vector.broadcast %cst_49 : f32 to vector<1x8x128xf32>
    %483 = arith.mulf %482, %481 : vector<1x8x128xf32>
    %cst_50 = arith.constant 5.000000e-01 : f32
    %484 = vector.broadcast %cst_50 : f32 to vector<1x8x128xf32>
    %485 = arith.addf %483, %484 : vector<1x8x128xf32>
    %cst_51 = arith.constant 5.000000e-01 : f32
    %486 = vector.broadcast %cst_51 : f32 to vector<1x8x128xf32>
    %487 = arith.mulf %486, %429 : vector<1x8x128xf32>
    %488 = math.tanh %487 : vector<1x8x128xf32>
    %cst_52 = arith.constant 5.000000e-01 : f32
    %489 = vector.broadcast %cst_52 : f32 to vector<1x8x128xf32>
    %490 = arith.mulf %489, %488 : vector<1x8x128xf32>
    %cst_53 = arith.constant 5.000000e-01 : f32
    %491 = vector.broadcast %cst_53 : f32 to vector<1x8x128xf32>
    %492 = arith.addf %490, %491 : vector<1x8x128xf32>
    %c0_54 = arith.constant 0 : index
    %493 = arith.index_cast %1 : i32 to index
    %c0_55 = arith.constant 0 : index
    %494 = vector.load %arg3[%c0_54, %493, %c0_55] : memref<9x8x128xf32, #tpu.memory_space<vmem>>, vector<1x8x128xf32>
    tpu.vector_store %arg3[%c0_54, %493, %c0_55], %436 {strides = array<i32>} : memref<9x8x128xf32, #tpu.memory_space<vmem>>, vector<1x8x128xf32>,
    %c1_56 = arith.constant 1 : index
    %495 = arith.index_cast %1 : i32 to index
    %c0_57 = arith.constant 0 : index
    %496 = vector.load %arg3[%c1_56, %495, %c0_57] : memref<9x8x128xf32, #tpu.memory_space<vmem>>, vector<1x8x128xf32>
    tpu.vector_store %arg3[%c1_56, %495, %c0_57], %443 {strides = array<i32>} : memref<9x8x128xf32, #tpu.memory_space<vmem>>, vector<1x8x128xf32>,
    %c2_58 = arith.constant 2 : index
    %497 = arith.index_cast %1 : i32 to index
    %c0_59 = arith.constant 0 : index
    %498 = vector.load %arg3[%c2_58, %497, %c0_59] : memref<9x8x128xf32, #tpu.memory_space<vmem>>, vector<1x8x128xf32>
    tpu.vector_store %arg3[%c2_58, %497, %c0_59], %450 {strides = array<i32>} : memref<9x8x128xf32, #tpu.memory_space<vmem>>, vector<1x8x128xf32>,
    %c3_60 = arith.constant 3 : index
    %499 = arith.index_cast %1 : i32 to index
    %c0_61 = arith.constant 0 : index
    %500 = vector.load %arg3[%c3_60, %499, %c0_61] : memref<9x8x128xf32, #tpu.memory_space<vmem>>, vector<1x8x128xf32>
    tpu.vector_store %arg3[%c3_60, %499, %c0_61], %457 {strides = array<i32>} : memref<9x8x128xf32, #tpu.memory_space<vmem>>, vector<1x8x128xf32>,
    %c4_62 = arith.constant 4 : index
    %501 = arith.index_cast %1 : i32 to index
    %c0_63 = arith.constant 0 : index
    %502 = vector.load %arg3[%c4_62, %501, %c0_63] : memref<9x8x128xf32, #tpu.memory_space<vmem>>, vector<1x8x128xf32>
    tpu.vector_store %arg3[%c4_62, %501, %c0_63], %464 {strides = array<i32>} : memref<9x8x128xf32, #tpu.memory_space<vmem>>, vector<1x8x128xf32>,
    %c5_64 = arith.constant 5 : index
    %503 = arith.index_cast %1 : i32 to index
    %c0_65 = arith.constant 0 : index
    %504 = vector.load %arg3[%c5_64, %503, %c0_65] : memref<9x8x128xf32, #tpu.memory_space<vmem>>, vector<1x8x128xf32>
    tpu.vector_store %arg3[%c5_64, %503, %c0_65], %471 {strides = array<i32>} : memref<9x8x128xf32, #tpu.memory_space<vmem>>, vector<1x8x128xf32>,
    %c6_66 = arith.constant 6 : index
    %505 = arith.index_cast %1 : i32 to index
    %c0_67 = arith.constant 0 : index
    %506 = vector.load %arg3[%c6_66, %505, %c0_67] : memref<9x8x128xf32, #tpu.memory_space<vmem>>, vector<1x8x128xf32>
    tpu.vector_store %arg3[%c6_66, %505, %c0_67], %478 {strides = array<i32>} : memref<9x8x128xf32, #tpu.memory_space<vmem>>, vector<1x8x128xf32>,
    %c7_68 = arith.constant 7 : index
    %507 = arith.index_cast %1 : i32 to index
    %c0_69 = arith.constant 0 : index
    %508 = vector.load %arg3[%c7_68, %507, %c0_69] : memref<9x8x128xf32, #tpu.memory_space<vmem>>, vector<1x8x128xf32>
    tpu.vector_store %arg3[%c7_68, %507, %c0_69], %485 {strides = array<i32>} : memref<9x8x128xf32, #tpu.memory_space<vmem>>, vector<1x8x128xf32>,
    %c8_70 = arith.constant 8 : index
    %509 = arith.index_cast %1 : i32 to index
    %c0_71 = arith.constant 0 : index
    %510 = vector.load %arg3[%c8_70, %509, %c0_71] : memref<9x8x128xf32, #tpu.memory_space<vmem>>, vector<1x8x128xf32>
    tpu.vector_store %arg3[%c8_70, %509, %c0_71], %492 {strides = array<i32>} : memref<9x8x128xf32, #tpu.memory_space<vmem>>, vector<1x8x128xf32>,
    %c1_i32 = arith.constant 1 : i32
    return
  }
  func.func @transform_0(%arg0: i32) -> (i32, i32, i32) {
    %c0_i32 = arith.constant 0 : i32
    %c0_i32_0 = arith.constant 0 : i32
    %c0_i32_1 = arith.constant 0 : i32
    return %c0_i32, %arg0, %c0_i32_0 : i32, i32, i32
  }
  func.func @transform_1(%arg0: i32) -> i32 {
    %c0_i32 = arith.constant 0 : i32
    %c0_i32_0 = arith.constant 0 : i32
    return %c0_i32 : i32
  }
  func.func @transform_2(%arg0: i32) -> (i32, i32, i32) {
    %c0_i32 = arith.constant 0 : i32
    %c0_i32_0 = arith.constant 0 : i32
    %c0_i32_1 = arith.constant 0 : i32
    return %c0_i32, %arg0, %c0_i32_0 : i32, i32, i32
  }
}

</mosaic_0001>

<bundles_post_ra>
// kernel: autoencoder_forward.1
= control target key start
LH: loop header
LB: loop body
LE: loop exit
PB: predicated region body
PF: predicated region fallthrough
CT: control target
= control target key end

     0   :  { %7 = vsyncpa [#allocation3], 0  ;;  %s1074_s0 = inlined_call_operand.vmem [shape: f32[9,8,128], index: 0, kind: input, shape index: {}]   ;;  %s1075_s1 = inlined_call_operand.vmem [shape: f32[107], index: 1, kind: input, shape index: {}]   ;;  %s1076_s2 = inlined_call_operand.vmem [shape: f32[9,8,128], index: 2, kind: output, shape index: {}]  }
   0x1   :  { %s16_s11 = sshll.u32 %s1075_s1, 4  ;;  %s17_s11 = int_to_ptr.vmem [resolvable:$true] %s16_s11 }
   0x2   :  { %s664_s12 = scalar_lea.vmem %s17_s11, 16  ;;  %p669_p1 = scmp.lt.s32.totalorder %s17_s11, %s17_s11 }
   0x3   :  { %p665_p0 = scmp.ne.s32.totalorder %s17_s11, %s664_s12  ;;  %p670_p2 = scmp.lt.s32.totalorder %s664_s12, %s664_s12 }
   0x5   :  { %p671_p3 = por %p670_p2, %p669_p1 }
   0x7   :  { %p672_p4 = pnand %p671_p3, %p665_p0 }
   0x9   :  { %675 = shalt.err (!%p672_p4)
}
   0xa   :  { %s678_s13 = smov [#allocation2]  }
   0xb   :  { %19 = dma.vmem_to_smem %s17_s11, 16, %s678_s13, [#allocation3]  }
   0xc   :  { %676 = dma.done.wait [#allocation3], 16  }
   0xd   :  { %677 = vsyncadd [#allocation3], 4294967280 }
   0xe   :  { %23 = sfence }
   0xf   :  { %s49_s14 = sld [smem:[#allocation2]]  ;;  %v700_v0 = vld [vmem:[%s1074_s0] sm:$0xff]  ;;  %v705_v1 = vld [vmem:[%s1074_s0 + $0x8] sm:$0xff]  ;;  %v712_v2 = vld [vmem:[%s1074_s0 + $0x10] sm:$0xff] }
  0x10   :  { %s531_s15 = sld [smem:[#allocation2 + $0x1]]  ;;  %v722_v6 = vld [vmem:[%s1074_s0 + $0x18] sm:$0xff]  ;;  %v734_v13 = vld [vmem:[%s1074_s0 + $0x20] sm:$0xff]  ;;  %v742_v18 = vld [vmem:[%s1074_s0 + $0x28] sm:$0xff] }
  0x11   :  { %s532_s16 = sld [smem:[#allocation2 + $0x2]]  ;;  %v760_v29 = vld [vmem:[%s1074_s0 + $0x30] sm:$0xff]  ;;  %v771_v40 = vld [vmem:[%s1074_s0 + $0x38] sm:$0xff]  ;;  %v790_v52 = vld [vmem:[%s1074_s0 + $0x40] sm:$0xff] }
  0x12   :  { %s533_s17 = sld [smem:[#allocation2 + $0x3]] }
  0x13   :  { %s534_s1 = sld [smem:[#allocation2 + $0x4]] }
  0x14   :  { %s707_s22 = sld [smem:[#allocation2 + $0x5]] }
  0x15   :  { %v50_v3 = vstv %s49_s14  ;;  %s714_s25 = sld [smem:[#allocation2 + $0x6]] }
  0x16   :  { %v51_v4 = vmul.f32 %v50_v3, %v700_v0  ;;  %v53_v5 = vstv %s531_s15  ;;  %s717_s26 = sld [smem:[#allocation2 + $0x7]] }
  0x17   :  { %v54_v7 = vmul.f32 %v705_v1, %v53_v5  ;;  %v57_v8 = vstv %s532_s16  ;;  %s725_s29 = sld [smem:[#allocation2 + $0x8]] }
  0x18   :  { %v58_v9 = vmul.f32 %v712_v2, %v57_v8  ;;  %v61_v10 = vstv %s533_s17  ;;  %s728_s30 = sld [smem:[#allocation2 + $0x24]] }
  0x19   :  { %v55_v11 = vadd.f32 %v54_v7, %v51_v4  ;;  %s540_s3 = sld [smem:[#allocation2 + $0x9]]  ;;  %v62_v12 = vmul.f32 %v722_v6, %v61_v10  ;;  %v65_v15 = vstv %s534_s1 }
  0x1a   :  { %s541_s4 = sld [smem:[#allocation2 + $0xa]]  ;;  %v66_v17 = vmul.f32 %v734_v13, %v65_v15  ;;  %v69_v19 = vstv %s707_s22 }
  0x1b   :  { %v59_v14 = vadd.f32 %v58_v9, %v55_v11  ;;  %s542_s7 = sld [smem:[#allocation2 + $0xb]]  ;;  %v70_v26 = vmul.f32 %v742_v18, %v69_v19  ;;  %v73_v30 = vstv %s714_s25 }
  0x1c   :  { %s543_s8 = sld [smem:[#allocation2 + $0xc]]  ;;  %v74_v38 = vmul.f32 %v760_v29, %v73_v30  ;;  %v77_v41 = vstv %s717_s26 }
  0x1d   :  { %s544_s9 = sld [smem:[#allocation2 + $0xd]]  ;;  %v63_v16 = vadd.f32 %v62_v12, %v59_v14  ;;  %v78_v49 = vmul.f32 %v771_v40, %v77_v41  ;;  %v81_v53 = vstv %s725_s29 }
  0x1e   :  { %s737_s10 = sld [smem:[#allocation2 + $0xe]]  ;;  %v82_v5 = vmul.f32 %v790_v52, %v81_v53 }
  0x1f   :  { %v88_v20 = vstv %s540_s3  ;;  %s745_s13 = sld [smem:[#allocation2 + $0xf]]  ;;  %v67_v25 = vadd.f32 %v66_v17, %v63_v16  ;;  %v85_v17 = vstv %s728_s30 }
  0x20   :  { %v89_v21 = vmul.f32 %v88_v20, %v700_v0  ;;  %v91_v22 = vstv %s541_s4  ;;  %s748_s14 = sld [smem:[#allocation2 + $0x10]] }
  0x21   :  { %v92_v23 = vmul.f32 %v705_v1, %v91_v22  ;;  %v95_v24 = vstv %s542_s7  ;;  %s751_s15 = sld [smem:[#allocation2 + $0x11]]  ;;  %v71_v37 = vadd.f32 %v70_v26, %v67_v25 }
  0x22   :  { %v96_v27 = vmul.f32 %v712_v2, %v95_v24  ;;  %v99_v28 = vstv %s543_s8  ;;  %s755_s16 = sld [smem:[#allocation2 + $0x25]] }
  0x23   :  { %v93_v31 = vadd.f32 %v92_v23, %v89_v21  ;;  %v100_v32 = vmul.f32 %v722_v6, %v99_v28  ;;  %v103_v33 = vstv %s544_s9  ;;  %s550_s19 = sld [smem:[#allocation2 + $0x12]]  ;;  %v75_v48 = vadd.f32 %v74_v38, %v71_v37 }
  0x24   :  { %v107_v34 = vstv %s737_s10  ;;  %s551_s1 = sld [smem:[#allocation2 + $0x13]]  ;;  %v104_v36 = vmul.f32 %v734_v13, %v103_v33 }
  0x25   :  { %v97_v35 = vadd.f32 %v96_v27, %v93_v31  ;;  %s552_s20 = sld [smem:[#allocation2 + $0x14]]  ;;  %v111_v39 = vstv %s745_s13  ;;  %v108_v43 = vmul.f32 %v742_v18, %v107_v34  ;;  %v79_v4 = vadd.f32 %v78_v49, %v75_v48 }
  0x26   :  { %s553_s21 = sld [smem:[#allocation2 + $0x15]]  ;;  %v112_v45 = vmul.f32 %v760_v29, %v111_v39  ;;  %v115_v46 = vstv %s748_s14 }
  0x27   :  { %v101_v42 = vadd.f32 %v100_v32, %v97_v35  ;;  %s775_s24 = sld [smem:[#allocation2 + $0x16]]  ;;  %v116_v57 = vmul.f32 %v771_v40, %v115_v46  ;;  %v119_v58 = vstv %s751_s15  ;;  %v83_v16 = vadd.f32 %v82_v5, %v79_v4 }
  0x28   :  { %s777_s25 = sld [smem:[#allocation2 + $0x17]]  ;;  %v120_v11 = vmul.f32 %v790_v52, %v119_v58  ;;  %v123_v25 = vstv %s755_s16 }
  0x29   :  { %v105_v44 = vadd.f32 %v104_v36, %v101_v42  ;;  %v126_v47 = vstv %s550_s19  ;;  %s781_s27 = sld [smem:[#allocation2 + $0x18]] }
  0x2a   :  { %v127_v50 = vmul.f32 %v126_v47, %v700_v0  ;;  %v129_v51 = vstv %s551_s1  ;;  %s785_s26 = sld [smem:[#allocation2 + $0x19]] }
  0x2b   :  { %v109_v54 = vadd.f32 %v108_v43, %v105_v44  ;;  %v130_v55 = vmul.f32 %v705_v1, %v129_v51  ;;  %v133_v56 = vstv %s552_s20  ;;  %s794_s4 = sld [smem:[#allocation2 + $0x1a]] }
  0x2c   :  { %v134_v59 = vmul.f32 %v712_v2, %v133_v56  ;;  %v137_v60 = vstv %s553_s21  ;;  %s799_s5 = sld [smem:[#allocation2 + $0x26]] }
  0x2d   :  { %v113_v61 = vadd.f32 %v112_v45, %v109_v54  ;;  %v131_v62 = vadd.f32 %v130_v55, %v127_v50  ;;  %v138_v63 = vmul.f32 %v722_v6, %v137_v60  ;;  %v141_v3 = vstv %s775_s24  ;;  %s560_s0 = sld [smem:[#allocation2 + $0x1b]] }
  0x2e   :  { %v145_v7 = vstv %s777_s25  ;;  %s561_s29 = sld [smem:[#allocation2 + $0x1c]]  ;;  %v142_v9 = vmul.f32 %v734_v13, %v141_v3 }
  0x2f   :  { %v135_v8 = vadd.f32 %v134_v59, %v131_v62  ;;  %s562_s6 = sld [smem:[#allocation2 + $0x1d]]  ;;  %v117_v10 = vadd.f32 %v116_v57, %v113_v61  ;;  %v149_v12 = vstv %s781_s27  ;;  %v146_v15 = vmul.f32 %v742_v18, %v145_v7 }
  0x30   :  { %s563_s7 = sld [smem:[#allocation2 + $0x1e]]  ;;  %v153_v19 = vstv %s785_s26  ;;  %v150_v21 = vmul.f32 %v760_v29, %v149_v12 }
  0x31   :  { %v139_v14 = vadd.f32 %v138_v63, %v135_v8  ;;  %s809_s8 = sld [smem:[#allocation2 + $0x1f]]  ;;  %v157_v22 = vstv %s794_s4  ;;  %v121_v24 = vadd.f32 %v120_v11, %v117_v10  ;;  %v154_v30 = vmul.f32 %v771_v40, %v153_v19 }
  0x32   :  { %s813_s9 = sld [smem:[#allocation2 + $0x20]]  ;;  %v158_v33 = vmul.f32 %v790_v52, %v157_v22  ;;  %v161_v44 = vstv %s799_s5 }
  0x33   :  { %v143_v20 = vadd.f32 %v142_v9, %v139_v14  ;;  %v164_v23 = vstv %s560_s0  ;;  %s817_s10 = sld [smem:[#allocation2 + $0x21]]  ;;  %v124_v39 = vadd.f32 %v123_v25, %v121_v24 }
  0x34   :  { %v165_v26 = vmul.f32 %v164_v23, %v700_v0  ;;  %v167_v27 = vstv %s561_s29  ;;  %s821_s11 = sld [smem:[#allocation2 + $0x22]] }
  0x35   :  { %v147_v28 = vadd.f32 %v146_v15, %v143_v20  ;;  %v168_v31 = vmul.f32 %v705_v1, %v167_v27  ;;  %v171_v32 = vstv %s562_s6  ;;  %s825_s30 = sld [smem:[#allocation2 + $0x23]]  ;;  %v86_v1 = vadd.f32 %v85_v17, %v83_v16 }
  0x36   :  { %v172_v34 = vmul.f32 %v712_v2, %v171_v32  ;;  %v175_v35 = vstv %s563_s7  ;;  %s829_s12 = sld [smem:[#allocation2 + $0x27]]  ;;  %v202_v50 = vmax.f32 %v124_v39, 0.0 }
  0x37   :  { %v151_v0 = vadd.f32 %v150_v21, %v147_v28  ;;  %v169_v36 = vadd.f32 %v168_v31, %v165_v26  ;;  %v176_v37 = vmul.f32 %v722_v6, %v175_v35  ;;  %v179_v38 = vstv %s809_s8  ;;  %s833_s13 = sld [smem:[#allocation2 + $0x28]] }
  0x38   :  { %v183_v41 = vstv %s813_s9  ;;  %s836_s14 = sld [smem:[#allocation2 + $0x29]]  ;;  %v180_v43 = vmul.f32 %v734_v13, %v179_v38  ;;  %v201_v49 = vmax.f32 %v86_v1, 0.0 }
  0x39   :  { %v155_v42 = vadd.f32 %v154_v30, %v151_v0  ;;  %v173_v2 = vadd.f32 %v172_v34, %v169_v36  ;;  %s839_s15 = sld [smem:[#allocation2 + $0x2a]]  ;;  %v187_v45 = vstv %s817_s10  ;;  %v184_v47 = vmul.f32 %v742_v18, %v183_v41 }
  0x3a   :  { %s843_s16 = sld [smem:[#allocation2 + $0x2b]]  ;;  %v191_v48 = vstv %s821_s11  ;;  %v188_v53 = vmul.f32 %v760_v29, %v187_v45 }
  0x3b   :  { %v159_v6 = vadd.f32 %v158_v33, %v155_v42  ;;  %v177_v46 = vadd.f32 %v176_v37, %v173_v2  ;;  %s846_s17 = sld [smem:[#allocation2 + $0x30]]  ;;  %v195_v54 = vstv %s825_s30  ;;  %v192_v58 = vmul.f32 %v771_v40, %v191_v48 }
  0x3c   :  { %s575_s18 = sld [smem:[#allocation2 + $0x2c]]  ;;  %v196_v18 = vmul.f32 %v790_v52, %v195_v54  ;;  %v199_v52 = vstv %s829_s12 }
  0x3d   :  { %v162_v13 = vadd.f32 %v161_v44, %v159_v6  ;;  %v181_v51 = vadd.f32 %v180_v43, %v177_v46  ;;  %s576_s19 = sld [smem:[#allocation2 + $0x2d]]  ;;  %v206_v55 = vstv %s833_s13 }
  0x3e   :  { %v209_v56 = vstv %s836_s14  ;;  %s577_s1 = sld [smem:[#allocation2 + $0x2e]]  ;;  %v207_v61 = vmul.f32 %v206_v55, %v201_v49 }
  0x3f   :  { %v185_v57 = vadd.f32 %v184_v47, %v181_v51  ;;  %s854_s20 = sld [smem:[#allocation2 + $0x2f]]  ;;  %v203_v60 = vmax.f32 %v162_v13, 0.0  ;;  %v210_v29 = vmul.f32 %v209_v56, %v202_v50  ;;  %v213_v62 = vstv %s839_s15 }
  0x40   :  { %s857_s21 = sld [smem:[#allocation2 + $0x31]]  ;;  %v217_v15 = vstv %s843_s16 }
  0x41   :  { %v189_v59 = vadd.f32 %v188_v53, %v185_v57  ;;  %s859_s22 = sld [smem:[#allocation2 + $0x32]]  ;;  %v211_v9 = vadd.f32 %v210_v29, %v207_v61  ;;  %v214_v10 = vmul.f32 %v213_v62, %v203_v60  ;;  %v221_v23 = vstv %s846_s17 }
  0x42   :  { %v224_v63 = vstv %s575_s18  ;;  %s862_s23 = sld [smem:[#allocation2 + $0x33]] }
  0x43   :  { %v193_v3 = vadd.f32 %v192_v58, %v189_v59  ;;  %v225_v4 = vmul.f32 %v224_v63, %v201_v49  ;;  %v227_v40 = vstv %s576_s19  ;;  %s864_s24 = sld [smem:[#allocation2 + $0x3a]]  ;;  %v215_v19 = vadd.f32 %v214_v10, %v211_v9 }
  0x44   :  { %v228_v5 = vmul.f32 %v227_v40, %v202_v50  ;;  %v231_v7 = vstv %s577_s1  ;;  %s867_s25 = sld [smem:[#allocation2 + $0x34]] }
  0x45   :  { %v197_v8 = vadd.f32 %v196_v18, %v193_v3  ;;  %v232_v11 = vmul.f32 %v231_v7, %v203_v60  ;;  %s869_s27 = sld [smem:[#allocation2 + $0x35]]  ;;  %v235_v16 = vstv %s854_s20 }
  0x46   :  { %v229_v12 = vadd.f32 %v228_v5, %v225_v4  ;;  %s871_s26 = sld [smem:[#allocation2 + $0x3b]]  ;;  %v239_v24 = vstv %s857_s21 }
  0x47   :  { %v200_v14 = vadd.f32 %v199_v52, %v197_v8  ;;  %s873_s28 = sld [smem:[#allocation2 + $0x36]]  ;;  %v244_v30 = vstv %s859_s22 }
  0x48   :  { %s877_s3 = sld [smem:[#allocation2 + $0x37]]  ;;  %v233_v20 = vadd.f32 %v232_v11, %v229_v12  ;;  %v247_v31 = vstv %s862_s23 }
  0x49   :  { %v204_v17 = vmax.f32 %v200_v14, 0.0  ;;  %s879_s4 = sld [smem:[#allocation2 + $0x3c]]  ;;  %v251_v1 = vstv %s864_s24 }
  0x4a   :  { %s881_s5 = sld [smem:[#allocation2 + $0x38]]  ;;  %v254_v32 = vstv %s867_s25 }
  0x4b   :  { %v218_v21 = vmul.f32 %v217_v15, %v204_v17  ;;  %v236_v22 = vmul.f32 %v235_v16, %v204_v17  ;;  %s883_s0 = sld [smem:[#allocation2 + $0x39]]  ;;  %v257_v33 = vstv %s869_s27 }
  0x4c   :  { %s887_s29 = sld [smem:[#allocation2 + $0x3d]]  ;;  %v261_v39 = vstv %s871_s26 }
  0x4d   :  { %v219_v25 = vadd.f32 %v218_v21, %v215_v19  ;;  %v237_v26 = vadd.f32 %v236_v22, %v233_v20  ;;  %s889_s6 = sld [smem:[#allocation2 + $0x3e]]  ;;  %v264_v34 = vstv %s873_s28 }
  0x4e   :  { %s891_s7 = sld [smem:[#allocation2 + $0x3f]]  ;;  %v267_v35 = vstv %s877_s3 }
  0x4f   :  { %v222_v27 = vadd.f32 %v221_v23, %v219_v25  ;;  %v240_v28 = vadd.f32 %v239_v24, %v237_v26  ;;  %s895_s8 = sld [smem:[#allocation2 + $0x40]]  ;;  %v271_v49 = vstv %s879_s4 }
  0x50   :  { %s901_s9 = sld [smem:[#allocation2 + $0x41]]  ;;  %v274_v37 = vstv %s881_s5 }
  0x51   :  { %v241_v0 = vmax.f32 %v222_v27, 0.0  ;;  %v242_v36 = vmax.f32 %v240_v28, 0.0  ;;  %v277_v38 = vstv %s883_s0  ;;  %s905_s10 = sld [smem:[#allocation2 + $0x62]] }
  0x52   :  { %s909_s11 = sld [smem:[#allocation2 + $0x42]]  ;;  %v281_v50 = vstv %s887_s29 }
  0x53   :  { %v245_v41 = vmul.f32 %v244_v30, %v241_v0  ;;  %v248_v42 = vmul.f32 %v247_v31, %v242_v36  ;;  %v255_v2 = vmul.f32 %v254_v32, %v241_v0  ;;  %v258_v43 = vmul.f32 %v257_v33, %v242_v36  ;;  %s911_s30 = sld [smem:[#allocation2 + $0x43]] }
  0x54   :  { %v265_v44 = vmul.f32 %v264_v34, %v241_v0  ;;  %v268_v45 = vmul.f32 %v267_v35, %v242_v36  ;;  %v275_v6 = vmul.f32 %v274_v37, %v241_v0  ;;  %v278_v46 = vmul.f32 %v277_v38, %v242_v36  ;;  %s913_s12 = sld [smem:[#allocation2 + $0x44]] }
  0x55   :  { %v249_v47 = vadd.f32 %v248_v42, %v245_v41  ;;  %v259_v48 = vadd.f32 %v258_v43, %v255_v2  ;;  %s917_s13 = sld [smem:[#allocation2 + $0x45]]  ;;  %v288_v55 = vstv %s889_s6  ;;  %v291_v58 = vstv %s891_s7 }
  0x56   :  { %v269_v13 = vadd.f32 %v268_v45, %v265_v44  ;;  %v279_v51 = vadd.f32 %v278_v46, %v275_v6  ;;  %s919_s14 = sld [smem:[#allocation2 + $0x63]]  ;;  %v295_v61 = vstv %s895_s8  ;;  %v299_v3 = vstv %s901_s9 }
  0x57   :  { %v252_v53 = vadd.f32 %v251_v1, %v249_v47  ;;  %v262_v54 = vadd.f32 %v261_v39, %v259_v48  ;;  %s922_s15 = sld [smem:[#allocation2 + $0x46]]  ;;  %v303_v23 = vstv %s905_s10 }
  0x58   :  { %v272_v56 = vadd.f32 %v271_v49, %v269_v13  ;;  %v282_v57 = vadd.f32 %v281_v50, %v279_v51  ;;  %v306_v18 = vstv %s909_s11  ;;  %s926_s16 = sld [smem:[#allocation2 + $0x47]] }
  0x59   :  { %v928_v59 = vmax.f32 %v252_v53, 0.0  ;;  %v930_v60 = vmax.f32 %v262_v54, 0.0  ;;  %v309_v29 = vstv %s911_s30  ;;  %s934_s17 = sld [smem:[#allocation2 + $0x48]] }
  0x5a   :  { %v936_v62 = vmax.f32 %v272_v56, 0.0  ;;  %v938_v63 = vmax.f32 %v282_v57, 0.0  ;;  %v313_v4 = vstv %s913_s12  ;;  %s942_s18 = sld [smem:[#allocation2 + $0x49]] }
  0x5b   :  { %v289_v40 = vmul.f32 %v288_v55, %v928_v59  ;;  %v292_v52 = vmul.f32 %v291_v58, %v930_v60  ;;  %v307_v5 = vmul.f32 %v306_v18, %v928_v59  ;;  %v310_v7 = vmul.f32 %v309_v29, %v930_v60  ;;  %s948_s19 = sld [smem:[#allocation2 + $0x64]] }
  0x5c   :  { %v296_v8 = vmul.f32 %v295_v61, %v936_v62  ;;  %v314_v9 = vmul.f32 %v313_v4, %v936_v62  ;;  %v317_v10 = vstv %s917_s13  ;;  %s607_s1 = sld [smem:[#allocation2 + $0x4a]]  ;;  %v300_v12 = vmul.f32 %v299_v3, %v938_v63 }
  0x5d   :  { %v293_v11 = vadd.f32 %v292_v52, %v289_v40  ;;  %v311_v14 = vadd.f32 %v310_v7, %v307_v5  ;;  %v318_v15 = vmul.f32 %v317_v10, %v938_v63  ;;  %s955_s20 = sld [smem:[#allocation2 + $0x4b]]  ;;  %v324_v16 = vstv %s922_s15 }
  0x5e   :  { %v327_v17 = vstv %s926_s16  ;;  %s959_s21 = sld [smem:[#allocation2 + $0x4c]]  ;;  %v325_v21 = vmul.f32 %v324_v16, %v928_v59  ;;  %v321_v24 = vstv %s919_s14 }
  0x5f   :  { %v297_v19 = vadd.f32 %v296_v8, %v293_v11  ;;  %v315_v20 = vadd.f32 %v314_v9, %v311_v14  ;;  %v328_v22 = vmul.f32 %v327_v17, %v930_v60  ;;  %s963_s22 = sld [smem:[#allocation2 + $0x4d]]  ;;  %v331_v25 = vstv %s934_s17 }
  0x60   :  { %v335_v26 = vstv %s942_s18  ;;  %s969_s23 = sld [smem:[#allocation2 + $0x65]]  ;;  %v332_v31 = vmul.f32 %v331_v25, %v936_v62 }
  0x61   :  { %v301_v27 = vadd.f32 %v300_v12, %v297_v19  ;;  %v319_v28 = vadd.f32 %v318_v15, %v315_v20  ;;  %v329_v30 = vadd.f32 %v328_v22, %v325_v21  ;;  %s972_s24 = sld [smem:[#allocation2 + $0x4e]]  ;;  %v336_v32 = vmul.f32 %v335_v26, %v938_v63 }
  0x62   :  { %v342_v33 = vstv %s607_s1  ;;  %s613_s25 = sld [smem:[#allocation2 + $0x4f]]  ;;  %v339_v37 = vstv %s948_s19 }
  0x63   :  { %v304_v34 = vadd.f32 %v303_v23, %v301_v27  ;;  %v322_v35 = vadd.f32 %v321_v24, %v319_v28  ;;  %v333_v0 = vadd.f32 %v332_v31, %v329_v30  ;;  %v343_v36 = vmul.f32 %v342_v33, %v928_v59  ;;  %s976_s27 = sld [smem:[#allocation2 + $0x50]] }
  0x64   :  { %v345_v38 = vstv %s955_s20  ;;  %v349_v1 = vstv %s959_s21  ;;  %s981_s26 = sld [smem:[#allocation2 + $0x51]] }
  0x65   :  { %v449_v39 = vmul.f32 0.5, %v304_v34  ;;  %v453_v41 = vmul.f32 0.5, %v322_v35  ;;  %v337_v42 = vadd.f32 %v336_v32, %v333_v0  ;;  %v346_v2 = vmul.f32 %v345_v38, %v930_v60  ;;  %s984_s28 = sld [smem:[#allocation2 + $0x66]] }
  0x66   :  { %v350_v43 = vmul.f32 %v349_v1, %v936_v62  ;;  %v353_v44 = vstv %s963_s22  ;;  %s617_s3 = sld [smem:[#allocation2 + $0x52]]  ;;  %v357_v53 = vstv %s969_s23 }
  0x67   :  { %646 = vtanh.f32 %v449_v39  ;;  %v340_v45 = vadd.f32 %v339_v37, %v337_v42  ;;  %v347_v6 = vadd.f32 %v346_v2, %v343_v36  ;;  %v354_v46 = vmul.f32 %v353_v44, %v938_v63  ;;  %s618_s4 = sld [smem:[#allocation2 + $0x53]] }
  0x68   :  { %648 = vtanh.f32 %v453_v41  ;;  %v360_v47 = vstv %s972_s24  ;;  %v363_v48 = vstv %s613_s25  ;;  %s619_s5 = sld [smem:[#allocation2 + $0x54]] }
  0x69   :  { %v457_v49 = vmul.f32 0.5, %v340_v45  ;;  %v351_v50 = vadd.f32 %v350_v43, %v347_v6  ;;  %v361_v13 = vmul.f32 %v360_v47, %v928_v59  ;;  %v364_v51 = vmul.f32 %v363_v48, %v930_v60  ;;  %s620_s0 = sld [smem:[#allocation2 + $0x55]] }
  0x6a   :  { %v367_v54 = vstv %s976_s27  ;;  %v371_v55 = vstv %s981_s26  ;;  %s995_s29 = sld [smem:[#allocation2 + $0x67]] }
  0x6b   :  { %650 = vtanh.f32 %v457_v49  ;;  %v355_v56 = vadd.f32 %v354_v46, %v351_v50  ;;  %v365_v57 = vadd.f32 %v364_v51, %v361_v13  ;;  %v368_v58 = vmul.f32 %v367_v54, %v936_v62  ;;  %s622_s6 = sld [smem:[#allocation2 + $0x56]] }
  0x6c   :  { %v372_v18 = vmul.f32 %v371_v55, %v938_v63  ;;  %v378_v61 = vstv %s617_s3  ;;  %s623_s7 = sld [smem:[#allocation2 + $0x57]]  ;;  %v375_v52 = vstv %s984_s28 }
  0x6d   :  { %v358_v29 = vadd.f32 %v357_v53, %v355_v56  ;;  %v369_v3 = vadd.f32 %v368_v58, %v365_v57  ;;  %v379_v4 = vmul.f32 %v378_v61, %v928_v59  ;;  %v381_v40 = vstv %s618_s4  ;;  %s624_s8 = sld [smem:[#allocation2 + $0x58]] }
  0x6e   :  { %v382_v5 = vmul.f32 %v381_v40, %v930_v60  ;;  %v385_v7 = vstv %s619_s5  ;;  %s1002_s9 = sld [smem:[#allocation2 + $0x59]] }
  0x6f   :  { %v461_v8 = vmul.f32 0.5, %v358_v29  ;;  %v373_v9 = vadd.f32 %v372_v18, %v369_v3  ;;  %v386_v10 = vmul.f32 %v385_v7, %v936_v62  ;;  %v389_v11 = vstv %s620_s0  ;;  %s1005_s10 = sld [smem:[#allocation2 + $0x68]] }
  0x70   :  { %v383_v12 = vadd.f32 %v382_v5, %v379_v4  ;;  %v390_v14 = vmul.f32 %v389_v11, %v938_v63  ;;  %s1008_s11 = sld [smem:[#allocation2 + $0x5a]]  ;;  %v393_v22 = vstv %s995_s29 }
  0x71   :  { %652 = vtanh.f32 %v461_v8  ;;  %v376_v15 = vadd.f32 %v375_v52, %v373_v9  ;;  %v396_v16 = vstv %s622_s6  ;;  %s1010_s30 = sld [smem:[#allocation2 + $0x5b]] }
  0x72   :  { %v387_v17 = vadd.f32 %v386_v10, %v383_v12  ;;  %v397_v19 = vmul.f32 %v396_v16, %v928_v59  ;;  %v399_v20 = vstv %s623_s7  ;;  %s1013_s12 = sld [smem:[#allocation2 + $0x5c]] }
  0x73   :  { %v465_v21 = vmul.f32 0.5, %v376_v15  ;;  %v400_v23 = vmul.f32 %v399_v20, %v930_v60  ;;  %v403_v24 = vstv %s624_s8  ;;  %s1017_s13 = sld [smem:[#allocation2 + $0x5d]] }
  0x74   :  { %v647_v25 = vpop.eup %646  ;;  %v391_v26 = vadd.f32 %v390_v14, %v387_v17  ;;  %v404_v27 = vmul.f32 %v403_v24, %v936_v62  ;;  %v407_v28 = vstv %s1002_s9  ;;  %s1021_s14 = sld [smem:[#allocation2 + $0x69]] }
  0x75   :  { %v649_v30 = vpop.eup %648  ;;  %v451_v31 = vmul.f32 0.5, %v647_v25  ;;  %654 = vtanh.f32 %v465_v21  ;;  %v401_v32 = vadd.f32 %v400_v23, %v397_v19  ;;  %v408_v33 = vmul.f32 %v407_v28, %v938_v63  ;;  %s1024_s15 = sld [smem:[#allocation2 + $0x5e]] }
  0x76   :  { %v455_v34 = vmul.f32 0.5, %v649_v30  ;;  %v394_v35 = vadd.f32 %v393_v22, %v391_v26  ;;  %v411_v0 = vstv %s1005_s10  ;;  %v414_v36 = vstv %s1008_s11  ;;  %s1028_s16 = sld [smem:[#allocation2 + $0x5f]] }
  0x77   :  { %v452_v37 = vadd.f32 0.5, %v451_v31  ;;  %v405_v38 = vadd.f32 %v404_v27, %v401_v32  ;;  %v415_v1 = vmul.f32 %v414_v36, %v928_v59  ;;  %v417_v39 = vstv %s1010_s30  ;;  %s634_s17 = sld [smem:[#allocation2 + $0x60]] }
  0x78   :  { %v651_v41 = vpop.eup %650  ;;  %v456_v42 = vadd.f32 0.5, %v455_v34  ;;  %v469_v2 = vmul.f32 0.5, %v394_v35  ;;  %v418_v43 = vmul.f32 %v417_v39, %v930_v60  ;;  %v421_v44 = vstv %s1013_s12  ;;  %s635_s18 = sld [smem:[#allocation2 + $0x61]] }
  0x79   :  { %485 = vst [vmem:[%s1076_s2] sm:$0xff] %v452_v37  ;;  %v459_v45 = vmul.f32 0.5, %v651_v41  ;;  %v409_v6 = vadd.f32 %v408_v33, %v405_v38  ;;  %v422_v46 = vmul.f32 %v421_v44, %v936_v62  ;;  %v425_v47 = vstv %s1017_s13  ;;  %s1043_s22 = sld [smem:[#allocation2 + $0x6a]] }
  0x7a   :  { %637 = vst [vmem:[%s1076_s2 + $0x8] sm:$0xff] %v456_v42  ;;  %656 = vtanh.f32 %v469_v2  ;;  %v419_v48 = vadd.f32 %v418_v43, %v415_v1  ;;  %v426_v49 = vmul.f32 %v425_v47, %v938_v63  ;;  %v429_v57 = vstv %s1021_s14 }
  0x7b   :  { %v460_v50 = vadd.f32 0.5, %v459_v45  ;;  %v412_v13 = vadd.f32 %v411_v0, %v409_v6  ;;  %v432_v51 = vstv %s1024_s15 }
  0x7c   :  { %v423_v53 = vadd.f32 %v422_v46, %v419_v48  ;;  %v433_v54 = vmul.f32 %v432_v51, %v928_v59  ;;  %v435_v55 = vstv %s1028_s16 }
  0x7d   :  { %638 = vst [vmem:[%s1076_s2 + $0x10] sm:$0xff] %v460_v50  ;;  %v473_v56 = vmul.f32 0.5, %v412_v13  ;;  %v436_v58 = vmul.f32 %v435_v55, %v930_v60  ;;  %v439_v18 = vstv %s634_s17 }
  0x7e   :  { %v653_v61 = vpop.eup %652  ;;  %v427_v29 = vadd.f32 %v426_v49, %v423_v53  ;;  %v440_v3 = vmul.f32 %v439_v18, %v936_v62  ;;  %v443_v4 = vstv %s635_s18 }
  0x7f   :  { %v463_v40 = vmul.f32 0.5, %v653_v61  ;;  %658 = vtanh.f32 %v473_v56  ;;  %v437_v52 = vadd.f32 %v436_v58, %v433_v54  ;;  %v444_v59 = vmul.f32 %v443_v4, %v938_v63 }
  0x80   :  { %v430_v5 = vadd.f32 %v429_v57, %v427_v29  ;;  %v447_v11 = vstv %s1043_s22 }
  0x81   :  { %v464_v7 = vadd.f32 0.5, %v463_v40  ;;  %v441_v8 = vadd.f32 %v440_v3, %v437_v52 }
  0x82   :  { %v655_v9 = vpop.eup %654  ;;  %v477_v10 = vmul.f32 0.5, %v430_v5 }
  0x83   :  { %639 = vst [vmem:[%s1076_s2 + $0x18] sm:$0xff] %v464_v7  ;;  %v467_v60 = vmul.f32 0.5, %v655_v9  ;;  %v445_v12 = vadd.f32 %v444_v59, %v441_v8 }
  0x84   :  { %660 = vtanh.f32 %v477_v10 }
  0x85   :  { %v468_v62 = vadd.f32 0.5, %v467_v60  ;;  %v448_v14 = vadd.f32 %v447_v11, %v445_v12 }
  0x87   :  { %v657_v15 = vpop.eup %656  ;;  %640 = vst [vmem:[%s1076_s2 + $0x20] sm:$0xff] %v468_v62  ;;  %v481_v63 = vmul.f32 0.5, %v448_v14 }
  0x88   :  { %v471_v16 = vmul.f32 0.5, %v657_v15 }
  0x89   :  { %662 = vtanh.f32 %v481_v63 }
  0x8a   :  { %v472_v17 = vadd.f32 0.5, %v471_v16 }
  0x8c   :  { %v659_v19 = vpop.eup %658  ;;  %641 = vst [vmem:[%s1076_s2 + $0x28] sm:$0xff] %v472_v17 }
  0x8d   :  { %v475_v20 = vmul.f32 0.5, %v659_v19 }
  0x8f   :  { %v476_v21 = vadd.f32 0.5, %v475_v20 }
  0x91   :  { %v661_v22 = vpop.eup %660  ;;  %642 = vst [vmem:[%s1076_s2 + $0x30] sm:$0xff] %v476_v21 }
  0x92   :  { %v479_v23 = vmul.f32 0.5, %v661_v22 }
  0x94   :  { %v480_v24 = vadd.f32 0.5, %v479_v23 }
  0x96   :  { %v663_v25 = vpop.eup %662  ;;  %643 = vst [vmem:[%s1076_s2 + $0x38] sm:$0xff] %v480_v24 }
  0x97   :  { %v483_v26 = vmul.f32 0.5, %v663_v25 }
  0x99   :  { %v484_v27 = vadd.f32 0.5, %v483_v26 }
  0x9b   :  { %644 = vst [vmem:[%s1076_s2 + $0x40] sm:$0xff] %v484_v27 }
  0x9c   :  { %506 = vsyncpa [#allocation3], 1 }

</bundles_post_ra>
